<compile_context>
chip_gen: v7x
topology: tpu7x:2x2x1
jax: 0.10.0
libtpu: 0.0.40
codegen_flags: <defaults>
</compile_context>

<pallas_src>
import jax
import jax.numpy as jnp
from jax import lax
from jax.experimental import pallas as pl
from jax.experimental.pallas import tpu as pltpu

EPS = 1e-5
LANE = 128
VMEM_LIMIT = 48 * 1024 * 1024   # < v7x 64 MiB physical, > default scoped limits


# --------------------------------------------------------------------------- kernels

def _conv1x1_stats_kernel(x_ref, w_ref, h_ref, stat_ref):
    """h1 = x @ w1 (bf16 operands, f32 acc); bf16 store + per-tile sum/sumsq."""
    x = x_ref[...].astype(jnp.bfloat16)
    kp = w_ref.shape[0]
    if x.shape[1] != kp:                       # pad K in-kernel (input stays unpadded in HBM)
        x = jnp.pad(x, ((0, 0), (0, kp - x.shape[1])))
    h = jnp.dot(x, w_ref[...], preferred_element_type=jnp.float32)
    hb = h.astype(jnp.bfloat16)                # bf16 inter-pass storage
    h_ref[...] = hb
    hf = hb.astype(jnp.float32)                # stats on the values BN will see
    s = jnp.sum(hf, axis=0, keepdims=True)
    q = jnp.sum(hf * hf, axis=0, keepdims=True)
    stat_ref[...] = jnp.concatenate([s, q], axis=0).reshape(1, 2, hf.shape[1])


def _bn_relu_conv3x3_stats_kernel(cur_ref, top_ref, bot_ref, s_ref, t_ref, w2_ref,
                                  h2_ref, stat_ref):
    """bn1+relu -> 3x3 conv as 9 accumulated K=C dots (no materialized im2col)."""
    _, TH, W, C = cur_ref.shape
    hblk = pl.program_id(1)
    nblk = pl.num_programs(1)

    def bn_relu(v):
        return jnp.maximum(v.astype(jnp.float32) * s_ref[...] + t_ref[...], 0.0)

    cur = bn_relu(cur_ref[...]).reshape(TH, W, C)
    top = bn_relu(top_ref[...]).reshape(1, W, C)
    bot = bn_relu(bot_ref[...]).reshape(1, W, C)
    # conv2 zero padding: halo rows outside the image must be zero *after* bn+relu.
    top = top * (hblk > 0).astype(top.dtype)
    bot = bot * (hblk < nblk - 1).astype(bot.dtype)

    a = jnp.concatenate([top, cur, bot], axis=0).astype(jnp.bfloat16)   # (TH+2, W, C)
    ap = jnp.pad(a, ((0, 0), (1, 1), (0, 0)))                           # (TH+2, W+2, C)

    w2 = w2_ref[...]
    acc = jnp.zeros((TH * W, C), jnp.float32)
    for ky in range(3):
        for kx in range(3):
            tap = ap[ky:ky + TH, kx:kx + W, :].reshape(TH * W, C)
            wk = w2[(ky * 3 + kx) * C:(ky * 3 + kx + 1) * C, :]
            acc = acc + jnp.dot(tap, wk, preferred_element_type=jnp.float32)

    h2b = acc.astype(jnp.bfloat16)
    h2_ref[...] = h2b.reshape(1, TH, W, C)
    hf = h2b.astype(jnp.float32)
    s = jnp.sum(hf, axis=0, keepdims=True)
    q = jnp.sum(hf * hf, axis=0, keepdims=True)
    stat_ref[...] = jnp.concatenate([s, q], axis=0).reshape(1, 2, C)


def _bn_relu_conv1x1_stats_kernel(h_ref, s_ref, t_ref, w_ref, o_ref, stat_ref):
    """bn2+relu -> conv3 (1x1); bf16 store + per-tile sum/sumsq."""
    a = jnp.maximum(h_ref[...].astype(jnp.float32) * s_ref[...] + t_ref[...], 0.0)
    h = jnp.dot(a.astype(jnp.bfloat16), w_ref[...], preferred_element_type=jnp.float32)
    hb = h.astype(jnp.bfloat16)
    o_ref[...] = hb
    hf = hb.astype(jnp.float32)
    s = jnp.sum(hf, axis=0, keepdims=True)
    q = jnp.sum(hf * hf, axis=0, keepdims=True)
    stat_ref[...] = jnp.concatenate([s, q], axis=0).reshape(1, 2, hf.shape[1])


def _bn_residual_relu_kernel(h_ref, x_ref, s_ref, t_ref, o_ref):
    """out = relu(bn3(h3) + identity); only the Cout valid channels are written."""
    o_ref[...] = jnp.maximum(
        h_ref[...].astype(jnp.float32) * s_ref[...] + t_ref[...] + x_ref[...], 0.0)


# --------------------------------------------------------------------------- helpers

def _round_up(x, m):
    return (x + m - 1) // m * m


def _pad_axis(a, axis, target, value=0.0):
    if a.shape[axis] == target:
        return a
    pad = [(0, 0)] * a.ndim
    pad[axis] = (0, target - a.shape[axis])
    return jnp.pad(a, pad, constant_values=value)


def _row_tile(M, cap=2048, min_steps=16):
    """Largest multiple-of-8 divisor of M that is <= cap and gives ~min_steps steps."""
    if M % 8 != 0:
        # TODO(synk): pad+mask path for awkward M; a single block is fine at the
        # small M where this can actually occur.
        return M
    target = max(8, min(cap, _round_up(-(-M // min_steps), 8)))
    for t in range(target, 7, -8):
        if M % t == 0:
            return t
    return 8


def _h_tile(H, W, C, cap_bytes=512 * 1024):
    """Row-block height for the 3x3 pass: divisor of H, bf16 slab <= cap, and
    preferably >= 2 blocks per image (pipelining / 2-TC balance on v7x)."""
    ok = [t for t in range(1, H + 1) if H % t == 0 and t * W * C * 2 <= cap_bytes]
    if not ok:
        ok = [1]
    pref = [t for t in ok if t < H] if H > 8 else ok
    return max(pref or ok)


def _fold_bn(stat, count, gamma, beta):
    """Fold train-mode BN (biased var) into per-channel (scale, shift)."""
    tot = jnp.sum(stat, axis=0)                 # (2, C): [sum, sumsq]
    mean = tot[0] / count
    var = jnp.maximum(tot[1] / count - mean * mean, 0.0)
    scale = gamma.reshape(-1) * lax.rsqrt(var + EPS)
    shift = beta.reshape(-1) - mean * scale
    return scale.reshape(1, -1), shift.reshape(1, -1)


# --------------------------------------------------------------------------- forward

@jax.jit
def bottleneck_forward(x_nchw, params):
    """Bottleneck forward; x_nchw is PyTorch-layout (N, C, H, W)."""
    w1, w2, w3, g1, b1, g2, b2, g3, b3 = params
    Cin, C1 = w1.shape
    Cout = w3.shape[1]
    N, Cx, H, W = x_nchw.shape
    assert Cx == Cin
    assert Cout == Cin, "identity residual requires inplanes == planes * expansion"

    Cip = _round_up(Cin, LANE)          # conv1 K (padded in-kernel only)
    C1p = _round_up(C1, LANE)           # lane-dense bottleneck width
    M = N * H * W
    TM = _row_tile(M)
    G = M // TM
    TH = _h_tile(H, W, C1p)
    HB = H // TH

    # NCHW -> NHWC rows; no 128-lane padding of x is ever written to HBM.
    x2d = jnp.transpose(x_nchw, (0, 2, 3, 1)).astype(jnp.float32).reshape(M, Cin)

    w1p = _pad_axis(_pad_axis(w1, 0, Cip), 1, C1p).astype(jnp.bfloat16)
    w2p = _pad_axis(_pad_axis(w2, 1, C1p), 2, C1p).reshape(9 * C1p, C1p).astype(jnp.bfloat16)
    w3p = _pad_axis(w3, 0, C1p).astype(jnp.bfloat16)          # output channels unpadded
    g1p, b1p = _pad_axis(g1, 1, C1p, 1.0), _pad_axis(b1, 1, C1p)
    g2p, b2p = _pad_axis(g2, 1, C1p, 1.0), _pad_axis(b2, 1, C1p)

    cp1 = pltpu.CompilerParams(dimension_semantics=("parallel",),
                               vmem_limit_bytes=VMEM_LIMIT)
    cp2 = pltpu.CompilerParams(dimension_semantics=("parallel", "parallel"),
                               vmem_limit_bytes=VMEM_LIMIT)

    # ---- pass 1: conv1 (1x1) + stats(h1) ------------------------------------
    h1, st1 = pl.pallas_call(
        _conv1x1_stats_kernel,
        grid=(G,),
        in_specs=[pl.BlockSpec((TM, Cin), lambda i: (i, 0)),
                  pl.BlockSpec((Cip, C1p), lambda i: (0, 0))],
        out_specs=(pl.BlockSpec((TM, C1p), lambda i: (i, 0)),
                   pl.BlockSpec((1, 2, C1p), lambda i: (i, 0, 0))),
        out_shape=(jax.ShapeDtypeStruct((M, C1p), jnp.bfloat16),
                   jax.ShapeDtypeStruct((G, 2, C1p), jnp.float32)),
        compiler_params=cp1,
    )(x2d, w1p)
    s1, t1 = _fold_bn(st1, M, g1p, b1p)

    # ---- pass 2: bn1+relu -> conv2 (3x3), row-tiled with a 1-row halo --------
    h1_4d = h1.reshape(N, H, W, C1p)
    h2, st2 = pl.pallas_call(
        _bn_relu_conv3x3_stats_kernel,
        grid=(N, HB),
        in_specs=[pl.BlockSpec((1, TH, W, C1p), lambda n, h: (n, h, 0, 0)),
                  pl.BlockSpec((1, 1, W, C1p),
                               lambda n, h: (n, jnp.maximum(h * TH - 1, 0), 0, 0)),
                  pl.BlockSpec((1, 1, W, C1p),
                               lambda n, h: (n, jnp.minimum(h * TH + TH, H - 1), 0, 0)),
                  pl.BlockSpec((1, C1p), lambda n, h: (0, 0)),
                  pl.BlockSpec((1, C1p), lambda n, h: (0, 0)),
                  pl.BlockSpec((9 * C1p, C1p), lambda n, h: (0, 0))],
        out_specs=(pl.BlockSpec((1, TH, W, C1p), lambda n, h: (n, h, 0, 0)),
                   pl.BlockSpec((1, 2, C1p), lambda n, h: (n * HB + h, 0, 0))),
        out_shape=(jax.ShapeDtypeStruct((N, H, W, C1p), jnp.bfloat16),
                   jax.ShapeDtypeStruct((N * HB, 2, C1p), jnp.float32)),
        compiler_params=cp2,
    )(h1_4d, h1_4d, h1_4d, s1, t1, w2p)
    s2, t2 = _fold_bn(st2, M, g2p, b2p)

    # ---- pass 3: bn2+relu -> conv3 (1x1) + stats(h3) -------------------------
    h3, st3 = pl.pallas_call(
        _bn_relu_conv1x1_stats_kernel,
        grid=(G,),
        in_specs=[pl.BlockSpec((TM, C1p), lambda i: (i, 0)),
                  pl.BlockSpec((1, C1p), lambda i: (0, 0)),
                  pl.BlockSpec((1, C1p), lambda i: (0, 0)),
                  pl.BlockSpec((C1p, Cout), lambda i: (0, 0))],
        out_specs=(pl.BlockSpec((TM, Cout), lambda i: (i, 0)),
                   pl.BlockSpec((1, 2, Cout), lambda i: (i, 0, 0))),
        out_shape=(jax.ShapeDtypeStruct((M, Cout), jnp.bfloat16),
                   jax.ShapeDtypeStruct((G, 2, Cout), jnp.float32)),
        compiler_params=cp1,
    )(h2.reshape(M, C1p), s2, t2, w3p)
    s3, t3 = _fold_bn(st3, M, g3, b3)

    # ---- pass 4: bn3 + identity residual + relu ------------------------------
    out2d = pl.pallas_call(
        _bn_residual_relu_kernel,
        grid=(G,),
        in_specs=[pl.BlockSpec((TM, Cout), lambda i: (i, 0)),
                  pl.BlockSpec((TM, Cin), lambda i: (i, 0)),
                  pl.BlockSpec((1, Cout), lambda i: (0, 0)),
                  pl.BlockSpec((1, Cout), lambda i: (0, 0))],
        out_specs=pl.BlockSpec((TM, Cout), lambda i: (i, 0)),
        out_shape=jax.ShapeDtypeStruct((M, Cout), jnp.float32),
        compiler_params=cp1,
    )(h3, x2d, s3, t3)

    out = out2d.reshape(N, H, W, Cout)
    return jnp.transpose(out, (0, 3, 1, 2))            # NHWC -> NCHW


# --------------------------------------------------------------------------- reference

def ref_forward(x_nchw, params):
    """Pure-JAX reference mirroring the kernel's numerics (bf16 matmul operands,
    f32 accumulation, bf16 inter-stage storage) with standard train-mode BN."""
    x = jnp.transpose(x_nchw, (0, 2, 3, 1)).astype(jnp.float32)
    w1, w2, w3, g1, b1, g2, b2, g3, b3 = params
    C1 = w1.shape[1]
    r = lambda a: a.astype(jnp.bfloat16).astype(jnp.float32)

    def bn(h, g, b):
        mean = jnp.mean(h, axis=(0, 1, 2), keepdims=True)
        var = jnp.mean(jnp.square(h - mean), axis=(0, 1, 2), keepdims=True)
        return (h - mean) * lax.rsqrt(var + EPS) * g.reshape(1, 1, 1, -1) \
            + b.reshape(1, 1, 1, -1)

    h = jnp.einsum('nhwc,cd->nhwd', r(x), r(w1), precision=lax.Precision.HIGHEST)
    h = r(h)                                            # h1 stored in bf16
    h = jnp.maximum(bn(h, g1, b1), 0.0)
    h = lax.conv_general_dilated(
        r(h), r(w2.reshape(3, 3, C1, C1)),
        window_strides=(1, 1), padding=((1, 1), (1, 1)),
        dimension_numbers=('NHWC', 'HWIO', 'NHWC'),
        precision=lax.Precision.HIGHEST)
    h = r(h)                                            # h2 stored in bf16
    h = jnp.maximum(bn(h, g2, b2), 0.0)
    h = jnp.einsum('nhwc,cd->nhwd', r(h), r(w3), precision=lax.Precision.HIGHEST)
    h = r(h)                                            # h3 stored in bf16
    h = bn(h, g3, b3)
    return jnp.transpose(jnp.maximum(h + x, 0.0), (0, 3, 1, 2))


# --------------------------------------------------------------------------- main

if __name__ == "__main__":
    # Bottleneck(inplanes=16, planes=4): width = 4, out = planes*4 = 16 == inplanes
    N, Cin, H, W = 2, 16, 16, 16
    planes = 4
    width = planes            # base_width=64, groups=1
    Cout = planes * 4         # expansion = 4

    keys = jax.random.split(jax.random.PRNGKey(0), 10)
    x = jax.random.normal(keys[0], (N, Cin, H, W), jnp.float32)

    # conv weights (bias=False) in matmul-friendly layouts:
    #   w1: (Cin, width)   w2: (9, width, width) taps row-major (ky, kx)   w3: (width, Cout)
    w1 = 0.1 * jax.random.normal(keys[1], (Cin, width), jnp.float32)
    w2 = 0.1 * jax.random.normal(keys[2], (9, width, width), jnp.float32)
    w3 = 0.1 * jax.random.normal(keys[3], (width, Cout), jnp.float32)
    # BatchNorm affine params (gamma, beta), shaped (1, C)
    g1 = 1.0 + 0.1 * jax.random.normal(keys[4], (1, width), jnp.float32)
    b1 = 0.1 * jax.random.normal(keys[5], (1, width), jnp.float32)
    g2 = 1.0 + 0.1 * jax.random.normal(keys[6], (1, width), jnp.float32)
    b2 = 0.1 * jax.random.normal(keys[7], (1, width), jnp.float32)
    g3 = 1.0 + 0.1 * jax.random.normal(keys[8], (1, Cout), jnp.float32)
    b3 = 0.1 * jax.random.normal(keys[9], (1, Cout), jnp.float32)

    params = (w1, w2, w3, g1, b1, g2, b2, g3, b3)

    y = bottleneck_forward(x, params)
    jax.block_until_ready(y)

    y_ref = ref_forward(x, params)
    assert y.shape == (N, Cout, H, W)
    err = jnp.max(jnp.abs(y - y_ref))
    assert jnp.allclose(y, y_ref, atol=1e-2, rtol=1e-2), f"max err {err}"

    print("KERNEL_OK")
</pallas_src>

<mosaic_0001>
module attributes {stable_mosaic.version = 11 : i64} {
  func.func @_conv1x1_stats_kernel(%arg0: i32, %arg1: memref<32x16xf32, #tpu.memory_space<vmem>>, %arg2: memref<128x128xbf16, #tpu.memory_space<vmem>>, %arg3: memref<32x128xbf16, #tpu.memory_space<vmem>>, %arg4: memref<1x2x128xf32, #tpu.memory_space<vmem>>) attributes {dimension_semantics = [#tpu.dimension_semantics<parallel>], iteration_bounds = array<i64: 16>, scalar_prefetch = 0 : i64, scratch_operands = 0 : i64, tpu.core_type = #tpu.core_type<tc>, window_params = [{transform_indices = @transform_0, window_bounds = array<i64: 32, 16>}, {pipeline_mode = #tpu.pipeline_mode<synchronous>, transform_indices = @transform_1, window_bounds = array<i64: 128, 128>}, {transform_indices = @transform_2, window_bounds = array<i64: 32, 128>}, {transform_indices = @transform_3, window_bounds = array<i64: 1, 2, 128>}]} {
    %c0 = arith.constant 0 : index
    %c0_0 = arith.constant 0 : index
    %0 = vector.load %arg1[%c0, %c0_0] : memref<32x16xf32, #tpu.memory_space<vmem>>, vector<32x16xf32>
    %1 = arith.truncf %0 : vector<32x16xf32> to vector<32x16xbf16>
    %c0_i32 = arith.constant 0 : i32
    %2 = arith.sitofp %c0_i32 : i32 to bf16
    %3 = vector.broadcast %2 : bf16 to vector<32x112xbf16>
    %4 = tpu.concatenate %1, %3 in 1 : vector<32x16xbf16>, vector<32x112xbf16> -> vector<32x128xbf16>
    %c0_1 = arith.constant 0 : index
    %c0_2 = arith.constant 0 : index
    %5 = vector.load %arg2[%c0_1, %c0_2] : memref<128x128xbf16, #tpu.memory_space<vmem>>, vector<128x128xbf16>
    %cst = arith.constant dense<0.000000e+00> : vector<32x128xf32>
    %6 = tpu.matmul %4, %5, %cst {dimension_numbers = #tpu.dot_dimension_numbers<[1], [0], [0], [1], [0, 0, 1, 1], [], []>} : vector<32x128xbf16>, vector<128x128xbf16>, vector<32x128xf32> -> vector<32x128xf32>
    %7 = arith.truncf %6 : vector<32x128xf32> to vector<32x128xbf16>
    %c0_3 = arith.constant 0 : index
    %c0_4 = arith.constant 0 : index
    %8 = vector.load %arg3[%c0_3, %c0_4] : memref<32x128xbf16, #tpu.memory_space<vmem>>, vector<32x128xbf16>
    tpu.vector_store %arg3[%c0_3, %c0_4], %7 {strides = array<i32>} : memref<32x128xbf16, #tpu.memory_space<vmem>>, vector<32x128xbf16>,
    %9 = arith.extf %7 : vector<32x128xbf16> to vector<32x128xf32>
    %cst_5 = arith.constant dense<0.000000e+00> : vector<128xf32>
    %10 = vector.multi_reduction <add>, %9, %cst_5 [0] : vector<32x128xf32> to vector<128xf32>
    %11 = vector.shape_cast %10 : vector<128xf32> to vector<1x128xf32>
    %12 = arith.mulf %9, %9 : vector<32x128xf32>
    %cst_6 = arith.constant dense<0.000000e+00> : vector<128xf32>
    %13 = vector.multi_reduction <add>, %12, %cst_6 [0] : vector<32x128xf32> to vector<128xf32>
    %14 = vector.shape_cast %13 : vector<128xf32> to vector<1x128xf32>
    %15 = tpu.concatenate %11, %14 in 0 : vector<1x128xf32>, vector<1x128xf32> -> vector<2x128xf32>
    %16 = vector.shape_cast %15 : vector<2x128xf32> to vector<1x2x128xf32>
    %c0_7 = arith.constant 0 : index
    %c0_8 = arith.constant 0 : index
    %c0_9 = arith.constant 0 : index
    %17 = vector.load %arg4[%c0_7, %c0_8, %c0_9] : memref<1x2x128xf32, #tpu.memory_space<vmem>>, vector<1x2x128xf32>
    tpu.vector_store %arg4[%c0_7, %c0_8, %c0_9], %16 {strides = array<i32>} : memref<1x2x128xf32, #tpu.memory_space<vmem>>, vector<1x2x128xf32>,
    return
  }
  func.func @transform_0(%arg0: i32) -> (i32, i32) {
    %c0_i32 = arith.constant 0 : i32
    %c0_i32_0 = arith.constant 0 : i32
    return %arg0, %c0_i32 : i32, i32
  }
  func.func @transform_1(%arg0: i32) -> (i32, i32) {
    %c0_i32 = arith.constant 0 : i32
    %c0_i32_0 = arith.constant 0 : i32
    %c0_i32_1 = arith.constant 0 : i32
    return %c0_i32, %c0_i32_0 : i32, i32
  }
  func.func @transform_2(%arg0: i32) -> (i32, i32) {
    %c0_i32 = arith.constant 0 : i32
    %c0_i32_0 = arith.constant 0 : i32
    return %arg0, %c0_i32 : i32, i32
  }
  func.func @transform_3(%arg0: i32) -> (i32, i32, i32) {
    %c0_i32 = arith.constant 0 : i32
    %c0_i32_0 = arith.constant 0 : i32
    %c0_i32_1 = arith.constant 0 : i32
    return %arg0, %c0_i32, %c0_i32_0 : i32, i32, i32
  }
}

module attributes {stable_mosaic.version = 11 : i64} {
  func.func @_bn_relu_conv3x3_stats_kernel(%arg0: i32, %arg1: i32, %arg2: memref<1x8x16x128xbf16, #tpu.memory_space<vmem>>, %arg3: memref<1x1x16x128xbf16, #tpu.memory_space<vmem>>, %arg4: memref<1x1x16x128xbf16, #tpu.memory_space<vmem>>, %arg5: memref<1x128xf32, #tpu.memory_space<vmem>>, %arg6: memref<1x128xf32, #tpu.memory_space<vmem>>, %arg7: memref<1152x128xbf16, #tpu.memory_space<vmem>>, %arg8: memref<1x8x16x128xbf16, #tpu.memory_space<vmem>>, %arg9: memref<1x2x128xf32, #tpu.memory_space<vmem>>) attributes {dimension_semantics = [#tpu.dimension_semantics<parallel>, #tpu.dimension_semantics<parallel>], iteration_bounds = array<i64: 2, 2>, scalar_prefetch = 0 : i64, scratch_operands = 0 : i64, tpu.core_type = #tpu.core_type<tc>, window_params = [{transform_indices = @transform_0, window_bounds = array<i64: 1, 8, 16, 128>}, {transform_indices = @transform_1, window_bounds = array<i64: 1, 1, 16, 128>}, {transform_indices = @transform_2, window_bounds = array<i64: 1, 1, 16, 128>}, {pipeline_mode = #tpu.pipeline_mode<synchronous>, transform_indices = @transform_3, window_bounds = array<i64: 1, 128>}, {pipeline_mode = #tpu.pipeline_mode<synchronous>, transform_indices = @transform_4, window_bounds = array<i64: 1, 128>}, {pipeline_mode = #tpu.pipeline_mode<synchronous>, transform_indices = @transform_5, window_bounds = array<i64: 1152, 128>}, {transform_indices = @transform_6, window_bounds = array<i64: 1, 8, 16, 128>}, {transform_indices = @transform_7, window_bounds = array<i64: 1, 2, 128>}]} {
    %c0 = arith.constant 0 : index
    %c0_0 = arith.constant 0 : index
    %c0_1 = arith.constant 0 : index
    %c0_2 = arith.constant 0 : index
    %0 = vector.load %arg2[%c0, %c0_0, %c0_1, %c0_2] : memref<1x8x16x128xbf16, #tpu.memory_space<vmem>>, vector<1x8x16x128xbf16>
    %1 = arith.extf %0 : vector<1x8x16x128xbf16> to vector<1x8x16x128xf32>
    %c0_3 = arith.constant 0 : index
    %c0_4 = arith.constant 0 : index
    %2 = vector.load %arg5[%c0_3, %c0_4] : memref<1x128xf32, #tpu.memory_space<vmem>>, vector<1x128xf32>
    %3 = vector.shape_cast %2 : vector<1x128xf32> to vector<1x1x1x128xf32>
    %4 = vector.broadcast %3 : vector<1x1x1x128xf32> to vector<1x8x16x128xf32>
    %5 = arith.mulf %1, %4 : vector<1x8x16x128xf32>
    %c0_5 = arith.constant 0 : index
    %c0_6 = arith.constant 0 : index
    %6 = vector.load %arg6[%c0_5, %c0_6] : memref<1x128xf32, #tpu.memory_space<vmem>>, vector<1x128xf32>
    %7 = vector.shape_cast %6 : vector<1x128xf32> to vector<1x1x1x128xf32>
    %8 = vector.broadcast %7 : vector<1x1x1x128xf32> to vector<1x8x16x128xf32>
    %9 = arith.addf %5, %8 : vector<1x8x16x128xf32>
    %cst = arith.constant 0.000000e+00 : f32
    %10 = vector.broadcast %cst : f32 to vector<1x8x16x128xf32>
    %11 = arith.maximumf %9, %10 : vector<1x8x16x128xf32>
    %12 = vector.shape_cast %11 : vector<1x8x16x128xf32> to vector<8x16x128xf32>
    %c0_7 = arith.constant 0 : index
    %c0_8 = arith.constant 0 : index
    %c0_9 = arith.constant 0 : index
    %c0_10 = arith.constant 0 : index
    %13 = vector.load %arg3[%c0_7, %c0_8, %c0_9, %c0_10] : memref<1x1x16x128xbf16, #tpu.memory_space<vmem>>, vector<1x1x16x128xbf16>
    %14 = arith.extf %13 : vector<1x1x16x128xbf16> to vector<1x1x16x128xf32>
    %c0_11 = arith.constant 0 : index
    %c0_12 = arith.constant 0 : index
    %15 = vector.load %arg5[%c0_11, %c0_12] : memref<1x128xf32, #tpu.memory_space<vmem>>, vector<1x128xf32>
    %16 = vector.shape_cast %15 : vector<1x128xf32> to vector<1x1x1x128xf32>
    %17 = vector.broadcast %16 : vector<1x1x1x128xf32> to vector<1x1x16x128xf32>
    %18 = arith.mulf %14, %17 : vector<1x1x16x128xf32>
    %c0_13 = arith.constant 0 : index
    %c0_14 = arith.constant 0 : index
    %19 = vector.load %arg6[%c0_13, %c0_14] : memref<1x128xf32, #tpu.memory_space<vmem>>, vector<1x128xf32>
    %20 = vector.shape_cast %19 : vector<1x128xf32> to vector<1x1x1x128xf32>
    %21 = vector.broadcast %20 : vector<1x1x1x128xf32> to vector<1x1x16x128xf32>
    %22 = arith.addf %18, %21 : vector<1x1x16x128xf32>
    %cst_15 = arith.constant 0.000000e+00 : f32
    %23 = vector.broadcast %cst_15 : f32 to vector<1x1x16x128xf32>
    %24 = arith.maximumf %22, %23 : vector<1x1x16x128xf32>
    %25 = vector.shape_cast %24 : vector<1x1x16x128xf32> to vector<1x16x128xf32>
    %c0_16 = arith.constant 0 : index
    %c0_17 = arith.constant 0 : index
    %c0_18 = arith.constant 0 : index
    %c0_19 = arith.constant 0 : index
    %26 = vector.load %arg4[%c0_16, %c0_17, %c0_18, %c0_19] : memref<1x1x16x128xbf16, #tpu.memory_space<vmem>>, vector<1x1x16x128xbf16>
    %27 = arith.extf %26 : vector<1x1x16x128xbf16> to vector<1x1x16x128xf32>
    %c0_20 = arith.constant 0 : index
    %c0_21 = arith.constant 0 : index
    %28 = vector.load %arg5[%c0_20, %c0_21] : memref<1x128xf32, #tpu.memory_space<vmem>>, vector<1x128xf32>
    %29 = vector.shape_cast %28 : vector<1x128xf32> to vector<1x1x1x128xf32>
    %30 = vector.broadcast %29 : vector<1x1x1x128xf32> to vector<1x1x16x128xf32>
    %31 = arith.mulf %27, %30 : vector<1x1x16x128xf32>
    %c0_22 = arith.constant 0 : index
    %c0_23 = arith.constant 0 : index
    %32 = vector.load %arg6[%c0_22, %c0_23] : memref<1x128xf32, #tpu.memory_space<vmem>>, vector<1x128xf32>
    %33 = vector.shape_cast %32 : vector<1x128xf32> to vector<1x1x1x128xf32>
    %34 = vector.broadcast %33 : vector<1x1x1x128xf32> to vector<1x1x16x128xf32>
    %35 = arith.addf %31, %34 : vector<1x1x16x128xf32>
    %cst_24 = arith.constant 0.000000e+00 : f32
    %36 = vector.broadcast %cst_24 : f32 to vector<1x1x16x128xf32>
    %37 = arith.maximumf %35, %36 : vector<1x1x16x128xf32>
    %38 = vector.shape_cast %37 : vector<1x1x16x128xf32> to vector<1x16x128xf32>
    %c0_i32 = arith.constant 0 : i32
    %39 = arith.cmpi sgt, %arg1, %c0_i32 : i32
    %40 = arith.extui %39 : i1 to i32
    %41 = arith.sitofp %40 : i32 to f32
    %42 = vector.broadcast %41 : f32 to vector<1x16x128xf32>
    %43 = arith.mulf %25, %42 : vector<1x16x128xf32>
    %c1_i32 = arith.constant 1 : i32
    %44 = arith.cmpi slt, %arg1, %c1_i32 : i32
    %45 = arith.extui %44 : i1 to i32
    %46 = arith.sitofp %45 : i32 to f32
    %47 = vector.broadcast %46 : f32 to vector<1x16x128xf32>
    %48 = arith.mulf %38, %47 : vector<1x16x128xf32>
    %49 = tpu.concatenate %43, %12, %48 in 0 : vector<1x16x128xf32>, vector<8x16x128xf32>, vector<1x16x128xf32> -> vector<10x16x128xf32>
    %50 = arith.truncf %49 : vector<10x16x128xf32> to vector<10x16x128xbf16>
    %c0_i32_25 = arith.constant 0 : i32
    %51 = arith.sitofp %c0_i32_25 : i32 to bf16
    %52 = vector.broadcast %51 : bf16 to vector<10x1x128xbf16>
    %53 = tpu.concatenate %52, %50 in 1 : vector<10x1x128xbf16>, vector<10x16x128xbf16> -> vector<10x17x128xbf16>
    %54 = vector.broadcast %51 : bf16 to vector<10x1x128xbf16>
    %55 = tpu.concatenate %53, %54 in 1 : vector<10x17x128xbf16>, vector<10x1x128xbf16> -> vector<10x18x128xbf16>
    %c0_26 = arith.constant 0 : index
    %c0_27 = arith.constant 0 : index
    %56 = vector.load %arg7[%c0_26, %c0_27] : memref<1152x128xbf16, #tpu.memory_space<vmem>>, vector<1152x128xbf16>
    %cst_28 = arith.constant 0.000000e+00 : f32
    %57 = vector.broadcast %cst_28 : f32 to vector<128x128xf32>
    %58 = vector.extract_strided_slice %55 {offsets = [0, 0, 0], sizes = [8, 16, 128], strides = [1, 1, 1]} : vector<10x18x128xbf16> to vector<8x16x128xbf16>
    %59 = vector.shape_cast %58 : vector<8x16x128xbf16> to vector<128x128xbf16>
    %60 = vector.extract_strided_slice %56 {offsets = [0, 0], sizes = [128, 128], strides = [1, 1]} : vector<1152x128xbf16> to vector<128x128xbf16>
    %cst_29 = arith.constant dense<0.000000e+00> : vector<128x128xf32>
    %61 = tpu.matmul %59, %60, %cst_29 {dimension_numbers = #tpu.dot_dimension_numbers<[1], [0], [0], [1], [0, 0, 1, 1], [], []>} : vector<128x128xbf16>, vector<128x128xbf16>, vector<128x128xf32> -> vector<128x128xf32>
    %62 = arith.addf %57, %61 : vector<128x128xf32>
    %63 = vector.extract_strided_slice %55 {offsets = [0, 1, 0], sizes = [8, 16, 128], strides = [1, 1, 1]} : vector<10x18x128xbf16> to vector<8x16x128xbf16>
    %64 = vector.shape_cast %63 : vector<8x16x128xbf16> to vector<128x128xbf16>
    %65 = vector.extract_strided_slice %56 {offsets = [128, 0], sizes = [128, 128], strides = [1, 1]} : vector<1152x128xbf16> to vector<128x128xbf16>
    %cst_30 = arith.constant dense<0.000000e+00> : vector<128x128xf32>
    %66 = tpu.matmul %64, %65, %cst_30 {dimension_numbers = #tpu.dot_dimension_numbers<[1], [0], [0], [1], [0, 0, 1, 1], [], []>} : vector<128x128xbf16>, vector<128x128xbf16>, vector<128x128xf32> -> vector<128x128xf32>
    %67 = arith.addf %62, %66 : vector<128x128xf32>
    %68 = vector.extract_strided_slice %55 {offsets = [0, 2, 0], sizes = [8, 16, 128], strides = [1, 1, 1]} : vector<10x18x128xbf16> to vector<8x16x128xbf16>
    %69 = vector.shape_cast %68 : vector<8x16x128xbf16> to vector<128x128xbf16>
    %70 = vector.extract_strided_slice %56 {offsets = [256, 0], sizes = [128, 128], strides = [1, 1]} : vector<1152x128xbf16> to vector<128x128xbf16>
    %cst_31 = arith.constant dense<0.000000e+00> : vector<128x128xf32>
    %71 = tpu.matmul %69, %70, %cst_31 {dimension_numbers = #tpu.dot_dimension_numbers<[1], [0], [0], [1], [0, 0, 1, 1], [], []>} : vector<128x128xbf16>, vector<128x128xbf16>, vector<128x128xf32> -> vector<128x128xf32>
    %72 = arith.addf %67, %71 : vector<128x128xf32>
    %73 = vector.extract_strided_slice %55 {offsets = [1, 0, 0], sizes = [8, 16, 128], strides = [1, 1, 1]} : vector<10x18x128xbf16> to vector<8x16x128xbf16>
    %74 = vector.shape_cast %73 : vector<8x16x128xbf16> to vector<128x128xbf16>
    %75 = vector.extract_strided_slice %56 {offsets = [384, 0], sizes = [128, 128], strides = [1, 1]} : vector<1152x128xbf16> to vector<128x128xbf16>
    %cst_32 = arith.constant dense<0.000000e+00> : vector<128x128xf32>
    %76 = tpu.matmul %74, %75, %cst_32 {dimension_numbers = #tpu.dot_dimension_numbers<[1], [0], [0], [1], [0, 0, 1, 1], [], []>} : vector<128x128xbf16>, vector<128x128xbf16>, vector<128x128xf32> -> vector<128x128xf32>
    %77 = arith.addf %72, %76 : vector<128x128xf32>
    %78 = vector.extract_strided_slice %55 {offsets = [1, 1, 0], sizes = [8, 16, 128], strides = [1, 1, 1]} : vector<10x18x128xbf16> to vector<8x16x128xbf16>
    %79 = vector.shape_cast %78 : vector<8x16x128xbf16> to vector<128x128xbf16>
    %80 = vector.extract_strided_slice %56 {offsets = [512, 0], sizes = [128, 128], strides = [1, 1]} : vector<1152x128xbf16> to vector<128x128xbf16>
    %cst_33 = arith.constant dense<0.000000e+00> : vector<128x128xf32>
    %81 = tpu.matmul %79, %80, %cst_33 {dimension_numbers = #tpu.dot_dimension_numbers<[1], [0], [0], [1], [0, 0, 1, 1], [], []>} : vector<128x128xbf16>, vector<128x128xbf16>, vector<128x128xf32> -> vector<128x128xf32>
    %82 = arith.addf %77, %81 : vector<128x128xf32>
    %83 = vector.extract_strided_slice %55 {offsets = [1, 2, 0], sizes = [8, 16, 128], strides = [1, 1, 1]} : vector<10x18x128xbf16> to vector<8x16x128xbf16>
    %84 = vector.shape_cast %83 : vector<8x16x128xbf16> to vector<128x128xbf16>
    %85 = vector.extract_strided_slice %56 {offsets = [640, 0], sizes = [128, 128], strides = [1, 1]} : vector<1152x128xbf16> to vector<128x128xbf16>
    %cst_34 = arith.constant dense<0.000000e+00> : vector<128x128xf32>
    %86 = tpu.matmul %84, %85, %cst_34 {dimension_numbers = #tpu.dot_dimension_numbers<[1], [0], [0], [1], [0, 0, 1, 1], [], []>} : vector<128x128xbf16>, vector<128x128xbf16>, vector<128x128xf32> -> vector<128x128xf32>
    %87 = arith.addf %82, %86 : vector<128x128xf32>
    %88 = vector.extract_strided_slice %55 {offsets = [2, 0, 0], sizes = [8, 16, 128], strides = [1, 1, 1]} : vector<10x18x128xbf16> to vector<8x16x128xbf16>
    %89 = vector.shape_cast %88 : vector<8x16x128xbf16> to vector<128x128xbf16>
    %90 = vector.extract_strided_slice %56 {offsets = [768, 0], sizes = [128, 128], strides = [1, 1]} : vector<1152x128xbf16> to vector<128x128xbf16>
    %cst_35 = arith.constant dense<0.000000e+00> : vector<128x128xf32>
    %91 = tpu.matmul %89, %90, %cst_35 {dimension_numbers = #tpu.dot_dimension_numbers<[1], [0], [0], [1], [0, 0, 1, 1], [], []>} : vector<128x128xbf16>, vector<128x128xbf16>, vector<128x128xf32> -> vector<128x128xf32>
    %92 = arith.addf %87, %91 : vector<128x128xf32>
    %93 = vector.extract_strided_slice %55 {offsets = [2, 1, 0], sizes = [8, 16, 128], strides = [1, 1, 1]} : vector<10x18x128xbf16> to vector<8x16x128xbf16>
    %94 = vector.shape_cast %93 : vector<8x16x128xbf16> to vector<128x128xbf16>
    %95 = vector.extract_strided_slice %56 {offsets = [896, 0], sizes = [128, 128], strides = [1, 1]} : vector<1152x128xbf16> to vector<128x128xbf16>
    %cst_36 = arith.constant dense<0.000000e+00> : vector<128x128xf32>
    %96 = tpu.matmul %94, %95, %cst_36 {dimension_numbers = #tpu.dot_dimension_numbers<[1], [0], [0], [1], [0, 0, 1, 1], [], []>} : vector<128x128xbf16>, vector<128x128xbf16>, vector<128x128xf32> -> vector<128x128xf32>
    %97 = arith.addf %92, %96 : vector<128x128xf32>
    %98 = vector.extract_strided_slice %55 {offsets = [2, 2, 0], sizes = [8, 16, 128], strides = [1, 1, 1]} : vector<10x18x128xbf16> to vector<8x16x128xbf16>
    %99 = vector.shape_cast %98 : vector<8x16x128xbf16> to vector<128x128xbf16>
    %100 = vector.extract_strided_slice %56 {offsets = [1024, 0], sizes = [128, 128], strides = [1, 1]} : vector<1152x128xbf16> to vector<128x128xbf16>
    %cst_37 = arith.constant dense<0.000000e+00> : vector<128x128xf32>
    %101 = tpu.matmul %99, %100, %cst_37 {dimension_numbers = #tpu.dot_dimension_numbers<[1], [0], [0], [1], [0, 0, 1, 1], [], []>} : vector<128x128xbf16>, vector<128x128xbf16>, vector<128x128xf32> -> vector<128x128xf32>
    %102 = arith.addf %97, %101 : vector<128x128xf32>
    %103 = arith.truncf %102 : vector<128x128xf32> to vector<128x128xbf16>
    %104 = vector.shape_cast %103 : vector<128x128xbf16> to vector<1x8x16x128xbf16>
    %c0_38 = arith.constant 0 : index
    %c0_39 = arith.constant 0 : index
    %c0_40 = arith.constant 0 : index
    %c0_41 = arith.constant 0 : index
    %105 = vector.load %arg8[%c0_38, %c0_39, %c0_40, %c0_41] : memref<1x8x16x128xbf16, #tpu.memory_space<vmem>>, vector<1x8x16x128xbf16>
    tpu.vector_store %arg8[%c0_38, %c0_39, %c0_40, %c0_41], %104 {strides = array<i32>} : memref<1x8x16x128xbf16, #tpu.memory_space<vmem>>, vector<1x8x16x128xbf16>,
    %106 = arith.extf %103 : vector<128x128xbf16> to vector<128x128xf32>
    %cst_42 = arith.constant dense<0.000000e+00> : vector<128xf32>
    %107 = vector.multi_reduction <add>, %106, %cst_42 [0] : vector<128x128xf32> to vector<128xf32>
    %108 = vector.shape_cast %107 : vector<128xf32> to vector<1x128xf32>
    %109 = arith.mulf %106, %106 : vector<128x128xf32>
    %cst_43 = arith.constant dense<0.000000e+00> : vector<128xf32>
    %110 = vector.multi_reduction <add>, %109, %cst_43 [0] : vector<128x128xf32> to vector<128xf32>
    %111 = vector.shape_cast %110 : vector<128xf32> to vector<1x128xf32>
    %112 = tpu.concatenate %108, %111 in 0 : vector<1x128xf32>, vector<1x128xf32> -> vector<2x128xf32>
    %113 = vector.shape_cast %112 : vector<2x128xf32> to vector<1x2x128xf32>
    %c0_44 = arith.constant 0 : index
    %c0_45 = arith.constant 0 : index
    %c0_46 = arith.constant 0 : index
    %114 = vector.load %arg9[%c0_44, %c0_45, %c0_46] : memref<1x2x128xf32, #tpu.memory_space<vmem>>, vector<1x2x128xf32>
    tpu.vector_store %arg9[%c0_44, %c0_45, %c0_46], %113 {strides = array<i32>} : memref<1x2x128xf32, #tpu.memory_space<vmem>>, vector<1x2x128xf32>,
    return
  }
  func.func @transform_0(%arg0: i32, %arg1: i32) -> (i32, i32, i32, i32) {
    %c0_i32 = arith.constant 0 : i32
    %c0_i32_0 = arith.constant 0 : i32
    %c0_i32_1 = arith.constant 0 : i32
    return %arg0, %arg1, %c0_i32, %c0_i32_0 : i32, i32, i32, i32
  }
  func.func @transform_1(%arg0: i32, %arg1: i32) -> (i32, i32, i32, i32) {
    %c8_i32 = arith.constant 8 : i32
    %0 = arith.muli %arg1, %c8_i32 : i32
    %c1_i32 = arith.constant 1 : i32
    %1 = arith.subi %0, %c1_i32 : i32
    %c0_i32 = arith.constant 0 : i32
    %2 = arith.maxsi %1, %c0_i32 : i32
    %c0_i32_0 = arith.constant 0 : i32
    %c0_i32_1 = arith.constant 0 : i32
    %c0_i32_2 = arith.constant 0 : i32
    return %arg0, %2, %c0_i32_0, %c0_i32_1 : i32, i32, i32, i32
  }
  func.func @transform_2(%arg0: i32, %arg1: i32) -> (i32, i32, i32, i32) {
    %c8_i32 = arith.constant 8 : i32
    %0 = arith.muli %arg1, %c8_i32 : i32
    %c8_i32_0 = arith.constant 8 : i32
    %1 = arith.addi %0, %c8_i32_0 : i32
    %c15_i32 = arith.constant 15 : i32
    %2 = arith.minsi %1, %c15_i32 : i32
    %c0_i32 = arith.constant 0 : i32
    %c0_i32_1 = arith.constant 0 : i32
    %c0_i32_2 = arith.constant 0 : i32
    return %arg0, %2, %c0_i32, %c0_i32_1 : i32, i32, i32, i32
  }
  func.func @transform_3(%arg0: i32, %arg1: i32) -> (i32, i32) {
    %c0_i32 = arith.constant 0 : i32
    %c0_i32_0 = arith.constant 0 : i32
    %c0_i32_1 = arith.constant 0 : i32
    return %c0_i32, %c0_i32_0 : i32, i32
  }
  func.func @transform_4(%arg0: i32, %arg1: i32) -> (i32, i32) {
    %c0_i32 = arith.constant 0 : i32
    %c0_i32_0 = arith.constant 0 : i32
    %c0_i32_1 = arith.constant 0 : i32
    return %c0_i32, %c0_i32_0 : i32, i32
  }
  func.func @transform_5(%arg0: i32, %arg1: i32) -> (i32, i32) {
    %c0_i32 = arith.constant 0 : i32
    %c0_i32_0 = arith.constant 0 : i32
    %c0_i32_1 = arith.constant 0 : i32
    return %c0_i32, %c0_i32_0 : i32, i32
  }
  func.func @transform_6(%arg0: i32, %arg1: i32) -> (i32, i32, i32, i32) {
    %c0_i32 = arith.constant 0 : i32
    %c0_i32_0 = arith.constant 0 : i32
    %c0_i32_1 = arith.constant 0 : i32
    return %arg0, %arg1, %c0_i32, %c0_i32_0 : i32, i32, i32, i32
  }
  func.func @transform_7(%arg0: i32, %arg1: i32) -> (i32, i32, i32) {
    %c2_i32 = arith.constant 2 : i32
    %0 = arith.muli %arg0, %c2_i32 : i32
    %1 = arith.addi %0, %arg1 : i32
    %c0_i32 = arith.constant 0 : i32
    %c0_i32_0 = arith.constant 0 : i32
    %c0_i32_1 = arith.constant 0 : i32
    return %1, %c0_i32, %c0_i32_0 : i32, i32, i32
  }
}

module attributes {stable_mosaic.version = 11 : i64} {
  func.func @_bn_relu_conv1x1_stats_kernel(%arg0: i32, %arg1: memref<32x128xbf16, #tpu.memory_space<vmem>>, %arg2: memref<1x128xf32, #tpu.memory_space<vmem>>, %arg3: memref<1x128xf32, #tpu.memory_space<vmem>>, %arg4: memref<128x16xbf16, #tpu.memory_space<vmem>>, %arg5: memref<32x16xbf16, #tpu.memory_space<vmem>>, %arg6: memref<1x2x16xf32, #tpu.memory_space<vmem>>) attributes {dimension_semantics = [#tpu.dimension_semantics<parallel>], iteration_bounds = array<i64: 16>, scalar_prefetch = 0 : i64, scratch_operands = 0 : i64, tpu.core_type = #tpu.core_type<tc>, window_params = [{transform_indices = @transform_0, window_bounds = array<i64: 32, 128>}, {pipeline_mode = #tpu.pipeline_mode<synchronous>, transform_indices = @transform_1, window_bounds = array<i64: 1, 128>}, {pipeline_mode = #tpu.pipeline_mode<synchronous>, transform_indices = @transform_2, window_bounds = array<i64: 1, 128>}, {pipeline_mode = #tpu.pipeline_mode<synchronous>, transform_indices = @transform_3, window_bounds = array<i64: 128, 16>}, {transform_indices = @transform_4, window_bounds = array<i64: 32, 16>}, {transform_indices = @transform_5, window_bounds = array<i64: 1, 2, 16>}]} {
    %c0 = arith.constant 0 : index
    %c0_0 = arith.constant 0 : index
    %0 = vector.load %arg1[%c0, %c0_0] : memref<32x128xbf16, #tpu.memory_space<vmem>>, vector<32x128xbf16>
    %1 = arith.extf %0 : vector<32x128xbf16> to vector<32x128xf32>
    %c0_1 = arith.constant 0 : index
    %c0_2 = arith.constant 0 : index
    %2 = vector.load %arg2[%c0_1, %c0_2] : memref<1x128xf32, #tpu.memory_space<vmem>>, vector<1x128xf32>
    %3 = vector.broadcast %2 : vector<1x128xf32> to vector<32x128xf32>
    %4 = arith.mulf %1, %3 : vector<32x128xf32>
    %c0_3 = arith.constant 0 : index
    %c0_4 = arith.constant 0 : index
    %5 = vector.load %arg3[%c0_3, %c0_4] : memref<1x128xf32, #tpu.memory_space<vmem>>, vector<1x128xf32>
    %6 = vector.broadcast %5 : vector<1x128xf32> to vector<32x128xf32>
    %7 = arith.addf %4, %6 : vector<32x128xf32>
    %cst = arith.constant 0.000000e+00 : f32
    %8 = vector.broadcast %cst : f32 to vector<32x128xf32>
    %9 = arith.maximumf %7, %8 : vector<32x128xf32>
    %10 = arith.truncf %9 : vector<32x128xf32> to vector<32x128xbf16>
    %c0_5 = arith.constant 0 : index
    %c0_6 = arith.constant 0 : index
    %11 = vector.load %arg4[%c0_5, %c0_6] : memref<128x16xbf16, #tpu.memory_space<vmem>>, vector<128x16xbf16>
    %cst_7 = arith.constant dense<0.000000e+00> : vector<32x16xf32>
    %12 = tpu.matmul %10, %11, %cst_7 {dimension_numbers = #tpu.dot_dimension_numbers<[1], [0], [0], [1], [0, 0, 1, 1], [], []>} : vector<32x128xbf16>, vector<128x16xbf16>, vector<32x16xf32> -> vector<32x16xf32>
    %13 = arith.truncf %12 : vector<32x16xf32> to vector<32x16xbf16>
    %c0_8 = arith.constant 0 : index
    %c0_9 = arith.constant 0 : index
    %14 = vector.load %arg5[%c0_8, %c0_9] : memref<32x16xbf16, #tpu.memory_space<vmem>>, vector<32x16xbf16>
    tpu.vector_store %arg5[%c0_8, %c0_9], %13 {strides = array<i32>} : memref<32x16xbf16, #tpu.memory_space<vmem>>, vector<32x16xbf16>,
    %15 = arith.extf %13 : vector<32x16xbf16> to vector<32x16xf32>
    %cst_10 = arith.constant dense<0.000000e+00> : vector<16xf32>
    %16 = vector.multi_reduction <add>, %15, %cst_10 [0] : vector<32x16xf32> to vector<16xf32>
    %17 = vector.shape_cast %16 : vector<16xf32> to vector<1x16xf32>
    %18 = arith.mulf %15, %15 : vector<32x16xf32>
    %cst_11 = arith.constant dense<0.000000e+00> : vector<16xf32>
    %19 = vector.multi_reduction <add>, %18, %cst_11 [0] : vector<32x16xf32> to vector<16xf32>
    %20 = vector.shape_cast %19 : vector<16xf32> to vector<1x16xf32>
    %21 = tpu.concatenate %17, %20 in 0 : vector<1x16xf32>, vector<1x16xf32> -> vector<2x16xf32>
    %22 = vector.shape_cast %21 : vector<2x16xf32> to vector<1x2x16xf32>
    %c0_12 = arith.constant 0 : index
    %c0_13 = arith.constant 0 : index
    %c0_14 = arith.constant 0 : index
    %23 = vector.load %arg6[%c0_12, %c0_13, %c0_14] : memref<1x2x16xf32, #tpu.memory_space<vmem>>, vector<1x2x16xf32>
    tpu.vector_store %arg6[%c0_12, %c0_13, %c0_14], %22 {strides = array<i32>} : memref<1x2x16xf32, #tpu.memory_space<vmem>>, vector<1x2x16xf32>,
    return
  }
  func.func @transform_0(%arg0: i32) -> (i32, i32) {
    %c0_i32 = arith.constant 0 : i32
    %c0_i32_0 = arith.constant 0 : i32
    return %arg0, %c0_i32 : i32, i32
  }
  func.func @transform_1(%arg0: i32) -> (i32, i32) {
    %c0_i32 = arith.constant 0 : i32
    %c0_i32_0 = arith.constant 0 : i32
    %c0_i32_1 = arith.constant 0 : i32
    return %c0_i32, %c0_i32_0 : i32, i32
  }
  func.func @transform_2(%arg0: i32) -> (i32, i32) {
    %c0_i32 = arith.constant 0 : i32
    %c0_i32_0 = arith.constant 0 : i32
    %c0_i32_1 = arith.constant 0 : i32
    return %c0_i32, %c0_i32_0 : i32, i32
  }
  func.func @transform_3(%arg0: i32) -> (i32, i32) {
    %c0_i32 = arith.constant 0 : i32
    %c0_i32_0 = arith.constant 0 : i32
    %c0_i32_1 = arith.constant 0 : i32
    return %c0_i32, %c0_i32_0 : i32, i32
  }
  func.func @transform_4(%arg0: i32) -> (i32, i32) {
    %c0_i32 = arith.constant 0 : i32
    %c0_i32_0 = arith.constant 0 : i32
    return %arg0, %c0_i32 : i32, i32
  }
  func.func @transform_5(%arg0: i32) -> (i32, i32, i32) {
    %c0_i32 = arith.constant 0 : i32
    %c0_i32_0 = arith.constant 0 : i32
    %c0_i32_1 = arith.constant 0 : i32
    return %arg0, %c0_i32, %c0_i32_0 : i32, i32, i32
  }
}

module attributes {stable_mosaic.version = 11 : i64} {
  func.func @_bn_residual_relu_kernel(%arg0: i32, %arg1: memref<32x16xbf16, #tpu.memory_space<vmem>>, %arg2: memref<32x16xf32, #tpu.memory_space<vmem>>, %arg3: memref<1x16xf32, #tpu.memory_space<vmem>>, %arg4: memref<1x16xf32, #tpu.memory_space<vmem>>, %arg5: memref<32x16xf32, #tpu.memory_space<vmem>>) attributes {dimension_semantics = [#tpu.dimension_semantics<parallel>], iteration_bounds = array<i64: 16>, scalar_prefetch = 0 : i64, scratch_operands = 0 : i64, tpu.core_type = #tpu.core_type<tc>, window_params = [{transform_indices = @transform_0, window_bounds = array<i64: 32, 16>}, {transform_indices = @transform_1, window_bounds = array<i64: 32, 16>}, {pipeline_mode = #tpu.pipeline_mode<synchronous>, transform_indices = @transform_2, window_bounds = array<i64: 1, 16>}, {pipeline_mode = #tpu.pipeline_mode<synchronous>, transform_indices = @transform_3, window_bounds = array<i64: 1, 16>}, {transform_indices = @transform_4, window_bounds = array<i64: 32, 16>}]} {
    %c0 = arith.constant 0 : index
    %c0_0 = arith.constant 0 : index
    %0 = vector.load %arg1[%c0, %c0_0] : memref<32x16xbf16, #tpu.memory_space<vmem>>, vector<32x16xbf16>
    %1 = arith.extf %0 : vector<32x16xbf16> to vector<32x16xf32>
    %c0_1 = arith.constant 0 : index
    %c0_2 = arith.constant 0 : index
    %2 = vector.load %arg3[%c0_1, %c0_2] : memref<1x16xf32, #tpu.memory_space<vmem>>, vector<1x16xf32>
    %3 = vector.broadcast %2 : vector<1x16xf32> to vector<32x16xf32>
    %4 = arith.mulf %1, %3 : vector<32x16xf32>
    %c0_3 = arith.constant 0 : index
    %c0_4 = arith.constant 0 : index
    %5 = vector.load %arg4[%c0_3, %c0_4] : memref<1x16xf32, #tpu.memory_space<vmem>>, vector<1x16xf32>
    %6 = vector.broadcast %5 : vector<1x16xf32> to vector<32x16xf32>
    %7 = arith.addf %4, %6 : vector<32x16xf32>
    %c0_5 = arith.constant 0 : index
    %c0_6 = arith.constant 0 : index
    %8 = vector.load %arg2[%c0_5, %c0_6] : memref<32x16xf32, #tpu.memory_space<vmem>>, vector<32x16xf32>
    %9 = arith.addf %7, %8 : vector<32x16xf32>
    %cst = arith.constant 0.000000e+00 : f32
    %10 = vector.broadcast %cst : f32 to vector<32x16xf32>
    %11 = arith.maximumf %9, %10 : vector<32x16xf32>
    %c0_7 = arith.constant 0 : index
    %c0_8 = arith.constant 0 : index
    %12 = vector.load %arg5[%c0_7, %c0_8] : memref<32x16xf32, #tpu.memory_space<vmem>>, vector<32x16xf32>
    tpu.vector_store %arg5[%c0_7, %c0_8], %11 {strides = array<i32>} : memref<32x16xf32, #tpu.memory_space<vmem>>, vector<32x16xf32>,
    return
  }
  func.func @transform_0(%arg0: i32) -> (i32, i32) {
    %c0_i32 = arith.constant 0 : i32
    %c0_i32_0 = arith.constant 0 : i32
    return %arg0, %c0_i32 : i32, i32
  }
  func.func @transform_1(%arg0: i32) -> (i32, i32) {
    %c0_i32 = arith.constant 0 : i32
    %c0_i32_0 = arith.constant 0 : i32
    return %arg0, %c0_i32 : i32, i32
  }
  func.func @transform_2(%arg0: i32) -> (i32, i32) {
    %c0_i32 = arith.constant 0 : i32
    %c0_i32_0 = arith.constant 0 : i32
    %c0_i32_1 = arith.constant 0 : i32
    return %c0_i32, %c0_i32_0 : i32, i32
  }
  func.func @transform_3(%arg0: i32) -> (i32, i32) {
    %c0_i32 = arith.constant 0 : i32
    %c0_i32_0 = arith.constant 0 : i32
    %c0_i32_1 = arith.constant 0 : i32
    return %c0_i32, %c0_i32_0 : i32, i32
  }
  func.func @transform_4(%arg0: i32) -> (i32, i32) {
    %c0_i32 = arith.constant 0 : i32
    %c0_i32_0 = arith.constant 0 : i32
    return %arg0, %c0_i32 : i32, i32
  }
}

</mosaic_0001>

<bundles_post_ra>
// kernel: bottleneck_forward.4
= control target key start
LH: loop header
LB: loop body
LE: loop exit
PB: predicated region body
PF: predicated region fallthrough
CT: control target
= control target key end

     0   :  { %s564_s12 = smov 0   ;;  %s619_s0 = inlined_call_operand.vmem [shape: f32[512,16], index: 0, kind: input, shape index: {}]   ;;  %s620_s1 = inlined_call_operand.vmem [shape: bf16[128,128], index: 1, kind: input, shape index: {}]   ;;  %s621_s2 = inlined_call_operand.vmem [shape: bf16[512,128], index: 2, kind: output, shape index: {0}]   ;;  %s622_s3 = inlined_call_operand.vmem [shape: f32[16,2,128], index: 3, kind: output, shape index: {1}]  }
   0x1 LB: > { %s570_s13 = sadd.s32 4294967295, %s542_s12   ;;  %p453_p0 = scmp.ge.s32.totalorder %s542_s12, 1  ;;  %s542_s12 = sphi %s564_s12, %s14_s12  }
   0x2   : > { %p141_p1 = scmp.lt.s32.totalorder %s542_s12, 17 }
   0x4   : > { %p142_p2 = pnand %p453_p0, %p141_p1 }
   0x5   : > { %v528_v0 = vld [vmem:[%s620_s1] sm:$0xff] (!%p142_p2)   ;;  %s454_s16 = sshll.u32 (!%p142_p2), %s570_s13, 2  ;;  %v529_v1 = vld [vmem:[%s620_s1 + $0x8] sm:$0xff] (!%p142_p2)   ;;  %v530_v2 = vld [vmem:[%s620_s1 + $0x10] sm:$0xff] (!%p142_p2)   ;;  %vm192_vm0 = vcmask (!%p142_p2), 130048   ;;  %p181_p4 = scmp.lt.s32.totalorder (!%p142_p2), %s570_s13, 15 }
   0x6   : > { %145 = sbr.rel (%p142_p2) target bundleno = 279 (0x117), region = 28  ;;  %p170_p3 = scmp.lt.s32.totalorder (!%p142_p2), %s454_s16, 63  ;;  %500 = vmatprep.subr.bf16.mxu0 (!%p142_p2), %v528_v0  ;;  %v531_v3 = vld [vmem:[%s620_s1 + $0x18] sm:$0xff] (!%p142_p2)   ;;  %v532_v7 = vld [vmem:[%s620_s1 + $0x20] sm:$0xff] (!%p142_p2)   ;;  %v533_v8 = vld [vmem:[%s620_s1 + $0x28] sm:$0xff] (!%p142_p2)   ;;  %vm359_vm1 = vcmask (!%p142_p2), 1040384  }
   0x7   : > { %501 = vmatpush3.bf16.msra.mxu0 (!%p142_p2), %v528_v0  ;;  %v534_v9 = vld [vmem:[%s620_s1 + $0x30] sm:$0xff] (!%p142_p2)   ;;  %v535_v10 = vld [vmem:[%s620_s1 + $0x38] sm:$0xff] (!%p142_p2)  }
   0x8   : > { %502 = vmatprep.subr.bf16.mxu0 (!%p142_p2), %v529_v1 }
   0xb   : > { %503 = vmatpush3.bf16.msra.mxu0 (!%p142_p2), %v529_v1 }
   0xc   : > { %504 = vmatprep.subr.bf16.mxu0 (!%p142_p2), %v530_v2 }
   0xd   : > { %s624_s16 = smov (!%p170_p3, %s454_s16), 63  ;;  %s626_s13 = smov (!%p181_p4, %s570_s13), 15 }
   0xe   : > { %s455_s21 = sshll.u32 %s624_s16, 3  ;;  %s457_s8 = sshll.u32 %s624_s16, 2 }
   0xf   : > { %s173_s24 = scalar_lea.vmem %s619_s0, %s455_s21  ;;  %505 = vmatpush3.bf16.msra.mxu0 %v530_v2  ;;  %s179_s11 = scalar_lea.vmem %s621_s2, %s457_s8 }
  0x10   : > { %v186_v4 = vld [vmem:[%s173_s24] sm:$0xff]  ;;  %v187_v5 = vld [vmem:[%s173_s24 + $0x8] sm:$0xff]  ;;  %506 = vmatprep.subr.bf16.mxu0 %v531_v3  ;;  %v188_v11 = vld [vmem:[%s173_s24 + $0x10] sm:$0xff]  ;;  %s458_s14 = sshll.u32 %s626_s13, 1 }
  0x11   : > { %v190_v6 = vpack.c.bf16 %v187_v5, %v186_v4  ;;  %v189_v12 = vld [vmem:[%s173_s24 + $0x18] sm:$0xff]  ;;  %s184_s17 = scalar_lea.vmem %s622_s3, %s458_s14 }
  0x12   : > { %v191_v13 = vpack.c.bf16 %v189_v12, %v188_v11 }
  0x13   : > { %516 = vmatprep.mubr.msk.bf16.mxu0 %vm192_vm0, %v190_v6  ;;  %507 = vmatpush3.bf16.msra.mxu0 %v531_v3 }
  0x14   : > { %508 = vmatprep.subr.bf16.mxu0 %v532_v7 }
  0x17   : > { %509 = vmatpush3.bf16.msra.mxu0 %v532_v7 }
  0x18   : > { %510 = vmatprep.subr.bf16.mxu0 %v533_v8 }
  0x1b   : > { %511 = vmatpush3.bf16.msra.mxu0 %v533_v8 }
  0x1c   : > { %512 = vmatprep.subr.bf16.mxu0 %v534_v9 }
  0x1f   : > { %513 = vmatpush3.bf16.msra.mxu0 %v534_v9 }
  0x20   : > { %514 = vmatprep.subr.bf16.mxu0 %v535_v10 }
  0x23   : > { %515 = vmatpush3.bf16.msra.mxu0 %v535_v10 }
  0x26   : > { %517 = vmatmul.mubr.msk.bf16.vlgmr.msra.gmra.mrb[0].mxu0 %vm192_vm0, %v191_v13 }
  0xf9   : > { %v518_v14 = vpop.f32.mrb[0].mxu0 }
  0xfa   : > { %v298_v15 = vpop.f32.mrb[1].mxu0 }
  0xfb   : > { %v519_v16 = vpop.f32.mrb[2].mxu0 }
  0xfc   : > { %v314_v17 = vpack.c.bf16 %v519_v16, %v518_v14  ;;  %v301_v18 = vpop.f32.mrb[3].mxu0 }
  0xfd   : > { %v313_v19 = vpack.c.bf16 %v301_v18, %v298_v15 }
  0xfe   : > { %489 = vst [vmem:[%s179_s11 + $0x8] sm:$0xff] %v314_v17   ;;  %v335_v20 = vunpack.c.l.bf16 %v314_v17  ;;  %v336_v23 = vunpack.c.h.bf16 %v314_v17 }
  0xff   : > { %483 = vst [vmem:[%s179_s11] sm:$0xff] %v313_v19   ;;  %v333_v21 = vunpack.c.l.bf16 %v313_v19  ;;  %v334_v22 = vunpack.c.h.bf16 %v313_v19 }
 0x100   : > { %v348_v27 = vmul.f32 %v335_v20, %v335_v20  ;;  %v349_v30 = vmul.f32 %v336_v23, %v336_v23 }
 0x101   : > { %v337_v24 = vadd.f32 %v334_v22, %v333_v21  ;;  %v346_v25 = vmul.f32 %v333_v21, %v333_v21  ;;  %v347_v26 = vmul.f32 %v334_v22, %v334_v22 }
 0x103   : > { %v338_v28 = vadd.f32 %v337_v24, %v335_v20  ;;  %v350_v29 = vadd.f32 %v347_v26, %v346_v25 }
 0x105   : > { %v339_v31 = vadd.f32 %v338_v28, %v336_v23  ;;  %v351_v32 = vadd.f32 %v350_v29, %v348_v27 }
 0x107   : > { %v340_v33 = vrot.slane %v339_v31, 4  ;;  %v352_v34 = vadd.f32 %v351_v32, %v349_v30 }
 0x109   : > { %v341_v35 = vadd.f32 %v340_v33, %v339_v31  ;;  %v353_v36 = vrot.slane %v352_v34, 4 }
 0x10b   : > { %v342_v37 = vrot.slane %v341_v35, 2  ;;  %v354_v38 = vadd.f32 %v353_v36, %v352_v34 }
 0x10d   : > { %v343_v39 = vadd.f32 %v342_v37, %v341_v35  ;;  %v355_v40 = vrot.slane %v354_v38, 2 }
 0x10f   : > { %v344_v41 = vrot.slane %v343_v39, 1  ;;  %v356_v42 = vadd.f32 %v355_v40, %v354_v38 }
 0x111   : > { %v357_v43 = vrot.slane %v356_v42, 1  ;;  %v345_v44 = vadd.f32 %v344_v41, %v343_v39 }
 0x113   : > { %v358_v45 = vadd.f32 %v357_v43, %v356_v42 }
 0x115   : > { %v360_v46 = vsel %vm359_vm1, %v345_v44, %v358_v45 }
 0x116   : > { %361 = vst [vmem:[%s184_s17] sm:$0x3] %v360_v46 }
 0x117 PF: > { %s14_s12 = sadd.s32 1, %s542_s12  }
 0x118   : > { %p11_p5 = scmp.ge.s32.totalorder %s14_s12, 18  }
 0x11a   :  { %13 = sbr.rel (!%p11_p5) target bundleno = 1 (0x1), region = 70 }

// kernel: bottleneck_forward.6
= control target key start
LH: loop header
LB: loop body
LE: loop exit
PB: predicated region body
PF: predicated region fallthrough
CT: control target
= control target key end

     0   :  { %s659_s18 = smov 0   ;;  %s733_s0 = inlined_call_operand.vmem [shape: bf16[512,128], index: 0, kind: input, shape index: {}]   ;;  %s734_s1 = inlined_call_operand.vmem [shape: f32[1,128], index: 1, kind: input, shape index: {}]   ;;  %s735_s2 = inlined_call_operand.vmem [shape: f32[1,128], index: 2, kind: input, shape index: {}]   ;;  %s736_s3 = inlined_call_operand.vmem [shape: bf16[128,16], index: 3, kind: input, shape index: {}]   ;;  %s737_s4 = inlined_call_operand.vmem [shape: bf16[512,16], index: 4, kind: output, shape index: {0}]   ;;  %s738_s5 = inlined_call_operand.vmem [shape: f32[16,2,16], index: 5, kind: output, shape index: {1}]  }
   0x1 LB: > { %s665_s19 = sadd.s32 4294967295, %s627_s18   ;;  %p540_p0 = scmp.ge.s32.totalorder %s627_s18, 1  ;;  %s627_s18 = sphi %s659_s18, %s16_s18  }
   0x2   : > { %p191_p1 = scmp.lt.s32.totalorder %s627_s18, 17 }
   0x4   : > { %p192_p2 = pnand %p540_p0, %p191_p1 }
   0x5   : > { %v613_v0 = vld [vmem:[%s736_s3] sm:$0xff] (!%p192_p2)   ;;  %s541_s22 = sshll.u32 (!%p192_p2), %s665_s19, 2  ;;  %v614_v1 = vld [vmem:[%s736_s3 + $0x8] sm:$0xff] (!%p192_p2)   ;;  %v615_v2 = vld [vmem:[%s736_s3 + $0x10] sm:$0xff] (!%p192_p2)   ;;  %vm405_vm0 = vcmask (!%p192_p2), 125952   ;;  %vm414_vm1 = vcmask (!%p192_p2), 130048  }
   0x6   : > { %195 = sbr.rel (%p192_p2) target bundleno = 280 (0x118), region = 36  ;;  %p224_p3 = scmp.lt.s32.totalorder (!%p192_p2), %s541_s22, 63  ;;  %585 = vmatprep.subr.bf16.mxu0 (!%p192_p2), %v613_v0  ;;  %v616_v3 = vld [vmem:[%s736_s3 + $0x18] sm:$0xff] (!%p192_p2)   ;;  %v546_v5 = vld [vmem:[%s734_s1] ss:$0 sm:$0xff] (!%p192_p2)  ;;  %v618_v19 = vld [vmem:[%s736_s3 + $0x28] sm:$0xff] (!%p192_p2)  }
   0x7   : > { %586 = vmatpush3.bf16.msra.mxu0 (!%p192_p2), %v613_v0  ;;  %v547_v8 = vld [vmem:[%s735_s2] ss:$0 sm:$0xff] (!%p192_p2)  ;;  %v619_v23 = vld [vmem:[%s736_s3 + $0x30] sm:$0xff] (!%p192_p2)   ;;  %v620_v26 = vld [vmem:[%s736_s3 + $0x38] sm:$0xff] (!%p192_p2)   ;;  %p235_p4 = scmp.lt.s32.totalorder (!%p192_p2), %s665_s19, 15  ;;  %vm445_vm2 = vcmask (!%p192_p2), 1040384  }
   0x8   : > { %587 = vmatprep.subr.bf16.mxu0 (!%p192_p2), %v614_v1  ;;  %v617_v12 = vld [vmem:[%s736_s3 + $0x20] sm:$0xff] (!%p192_p2)   ;;  %vm447_vm3 = vcmask (!%p192_p2), 123904  }
   0xb   : > { %588 = vmatpush3.bf16.msra.mxu0 (!%p192_p2), %v614_v1 }
   0xc   : > { %589 = vmatprep.subr.bf16.mxu0 (!%p192_p2), %v615_v2 }
   0xd   : > { %s740_s22 = smov (!%p224_p3, %s541_s22), 63  ;;  %s742_s19 = smov (!%p235_p4, %s665_s19), 15 }
   0xe   : > { %s542_s27 = sshll.u32 %s740_s22, 2  ;;  %s545_s22 = sshll.u32 %s742_s19, 1 }
   0xf   : > { %s227_s30 = scalar_lea.vmem %s733_s0, %s542_s27  ;;  %590 = vmatpush3.bf16.msra.mxu0 %v615_v2  ;;  %s233_s25 = scalar_lea.vmem %s737_s4, %s542_s27 }
  0x10   : > { %v567_v4 = vld [vmem:[%s227_s30] sm:$0xff]   ;;  %v574_v9 = vld [vmem:[%s227_s30 + $0x8] sm:$0xff]   ;;  %591 = vmatprep.subr.bf16.mxu0 %v616_v3  ;;  %s238_s28 = scalar_lea.vmem %s738_s5, %s545_s22 }
  0x11   : > { %v568_v6 = vunpack.c.l.bf16 %v567_v4  ;;  %v569_v7 = vunpack.c.h.bf16 %v567_v4  ;;  %v572_v15 = vunpack.c.l.bf16 %v574_v9  ;;  %v573_v16 = vunpack.c.h.bf16 %v574_v9 }
  0x13   : > { %v255_v10 = vmul.f32 %v568_v6, %v546_v5  ;;  %v256_v11 = vmul.f32 %v569_v7, %v546_v5  ;;  %592 = vmatpush3.bf16.msra.mxu0 %v616_v3  ;;  %v257_v21 = vmul.f32 %v572_v15, %v546_v5  ;;  %v258_v22 = vmul.f32 %v573_v16, %v546_v5 }
  0x14   : > { %593 = vmatprep.subr.bf16.mxu0 %v617_v12 }
  0x15   : > { %v266_v13 = vadd.f32 %v547_v8, %v255_v10  ;;  %v267_v14 = vadd.f32 %v547_v8, %v256_v11  ;;  %v268_v24 = vadd.f32 %v547_v8, %v257_v21  ;;  %v269_v25 = vadd.f32 %v547_v8, %v258_v22 }
  0x17   : > { %v270_v17 = vmax.f32 %v266_v13, 0.0  ;;  %v271_v18 = vmax.f32 %v267_v14, 0.0  ;;  %594 = vmatpush3.bf16.msra.mxu0 %v617_v12  ;;  %v272_v27 = vmax.f32 %v268_v24, 0.0  ;;  %v273_v28 = vmax.f32 %v269_v25, 0.0 }
  0x18   : > { %595 = vmatprep.subr.bf16.mxu0 %v618_v19 }
  0x19   : > { %v274_v20 = vpack.c.bf16 %v271_v18, %v270_v17  ;;  %v275_v29 = vpack.c.bf16 %v273_v28, %v272_v27 }
  0x1b   : > { %601 = vmatprep.mubr.bf16.mxu0 %v274_v20  ;;  %596 = vmatpush3.bf16.msra.mxu0 %v618_v19 }
  0x1c   : > { %597 = vmatprep.subr.bf16.mxu0 %v619_v23 }
  0x1f   : > { %598 = vmatpush3.bf16.msra.mxu0 %v619_v23 }
  0x20   : > { %599 = vmatprep.subr.bf16.mxu0 %v620_v26 }
  0x23   : > { %600 = vmatpush3.bf16.msra.mxu0 %v620_v26 }
  0x26   : > { %602 = vmatmul.mubr.bf16.vlgmr.msra.gmra.mrb[0].mxu0 %v275_v29 }
  0xf9   : > { %v603_v30 = vpop.f32.mrb[0].mxu0 }
  0xfa   : > { %v564_v31 = vpack.c.bf16 %v603_v30, %v603_v30  ;;  %v374_v32 = vpop.f32.mrb[1].mxu0 }
  0xfb   : > { %v562_v33 = vpack.c.bf16 %v374_v32, %v374_v32  ;;  %v604_v34 = vpop.f32.mrb[2].mxu0 }
  0xfc   : > { %408 = vst.msk [vmem:[%s233_s25 + $0x8] sm:$0xf] %vm405_vm0, %v564_v31  ;;  %v390_v35 = vpack.c.bf16 %v604_v34, %v603_v30  ;;  %v565_v36 = vpack.c.bf16 %v604_v34, %v604_v34  ;;  %v377_v37 = vpop.f32.mrb[3].mxu0 }
  0xfd   : > { %406 = vst.msk [vmem:[%s233_s25] sm:$0xf] %vm405_vm0, %v562_v33  ;;  %v389_v38 = vpack.c.bf16 %v377_v37, %v374_v32  ;;  %v563_v39 = vpack.c.bf16 %v377_v37, %v377_v37 }
  0xfe   : > { %409 = vst.msk [vmem:[%s233_s25 + $0xc] sm:$0xf] %vm405_vm0, %v565_v36  ;;  %v412_v40 = vunpack.c.l.bf16 %v390_v35  ;;  %v413_v41 = vunpack.c.h.bf16 %v390_v35 }
  0xff   : > { %407 = vst.msk [vmem:[%s233_s25 + $0x4] sm:$0xf] %vm405_vm0, %v563_v39  ;;  %v410_v42 = vunpack.c.l.bf16 %v389_v38  ;;  %v411_v43 = vunpack.c.h.bf16 %v389_v38 }
 0x100   : > { %v430_v44 = vmul.f32 %v412_v40, %v412_v40  ;;  %v418_v50 = vsel %vm414_vm1, %v412_v40, 0.0  ;;  %v431_v51 = vmul.f32 %v413_v41, %v413_v41  ;;  %v420_v56 = vsel %vm414_vm1, %v413_v41, 0.0 }
 0x101   : > { %v415_v45 = vsel %vm414_vm1, %v410_v42, 0.0  ;;  %v416_v46 = vsel %vm414_vm1, %v411_v43, 0.0  ;;  %v428_v47 = vmul.f32 %v410_v42, %v410_v42  ;;  %v429_v48 = vmul.f32 %v411_v43, %v411_v43 }
 0x102   : > { %v417_v49 = vadd.f32 %v416_v46, %v415_v45  ;;  %v435_v57 = vsel %vm414_vm1, %v430_v44, 0.0  ;;  %v437_v60 = vsel %vm414_vm1, %v431_v51, 0.0 }
 0x103   : > { %v432_v52 = vsel %vm414_vm1, %v428_v47, 0.0  ;;  %v433_v53 = vsel %vm414_vm1, %v429_v48, 0.0 }
 0x104   : > { %v419_v54 = vadd.f32 %v418_v50, %v417_v49  ;;  %v434_v55 = vadd.f32 %v433_v53, %v432_v52 }
 0x106   : > { %v421_v58 = vadd.f32 %v420_v56, %v419_v54  ;;  %v436_v59 = vadd.f32 %v435_v57, %v434_v55 }
 0x108   : > { %v422_v61 = vrot.slane %v421_v58, 4  ;;  %v438_v62 = vadd.f32 %v437_v60, %v436_v59 }
 0x10a   : > { %v423_v63 = vadd.f32 %v422_v61, %v421_v58  ;;  %v439_v0 = vrot.slane %v438_v62, 4 }
 0x10c   : > { %v424_v1 = vrot.slane %v423_v63, 2  ;;  %v440_v2 = vadd.f32 %v439_v0, %v438_v62 }
 0x10e   : > { %v425_v3 = vadd.f32 %v424_v1, %v423_v63  ;;  %v441_v4 = vrot.slane %v440_v2, 2 }
 0x110   : > { %v426_v5 = vrot.slane %v425_v3, 1  ;;  %v442_v6 = vadd.f32 %v441_v4, %v440_v2 }
 0x112   : > { %v443_v7 = vrot.slane %v442_v6, 1  ;;  %v427_v8 = vadd.f32 %v426_v5, %v425_v3 }
 0x114   : > { %v444_v9 = vadd.f32 %v443_v7, %v442_v6 }
 0x116   : > { %v446_v10 = vsel %vm445_vm2, %v427_v8, %v444_v9 }
 0x117   : > { %448 = vst.msk [vmem:[%s238_s28] sm:$0x3] %vm447_vm3, %v446_v10 }
 0x118 PF: > { %s16_s18 = sadd.s32 1, %s627_s18  }
 0x119   : > { %p13_p5 = scmp.ge.s32.totalorder %s16_s18, 18  }
 0x11b   :  { %15 = sbr.rel (!%p13_p5) target bundleno = 1 (0x1), region = 78 }

// kernel: bottleneck_forward.7
= control target key start
LH: loop header
LB: loop body
LE: loop exit
PB: predicated region body
PF: predicated region fallthrough
CT: control target
= control target key end

     0   :  { %s403_s15 = smov 0   ;;  %s433_s0 = inlined_call_operand.vmem [shape: bf16[512,16], index: 0, kind: input, shape index: {}]   ;;  %s434_s1 = inlined_call_operand.vmem [shape: f32[512,16], index: 1, kind: input, shape index: {}]   ;;  %s435_s2 = inlined_call_operand.vmem [shape: f32[1,16], index: 2, kind: input, shape index: {}]   ;;  %s436_s3 = inlined_call_operand.vmem [shape: f32[1,16], index: 3, kind: input, shape index: {}]   ;;  %s437_s4 = inlined_call_operand.vmem [shape: f32[512,16], index: 4, kind: output, shape index: {}]  }
   0x1 LB: > { %s338_s16 = sadd.s32 4294967295, %s376_s15   ;;  %p342_p0 = scmp.ge.s32.totalorder %s376_s15, 1  ;;  %s376_s15 = sphi %s403_s15, %s14_s15  }
   0x2   : > { %p174_p1 = scmp.lt.s32.totalorder %s376_s15, 17 }
   0x4   : > { %p175_p2 = pnand %p342_p0, %p174_p1 }
   0x5   : > { %s343_s17 = sshll.u32 (!%p175_p2), %s338_s16, 2  ;;  %v349_v2 = vld [vmem:[%s435_s2] ss:$0 sm:$0xff] (!%p175_p2)  ;;  %vm265_vm0 = vcmask (!%p175_p2), 130048  }
   0x6   : > { %178 = sbr.rel (%p175_p2) target bundleno = 29 (0x1d), region = 36  ;;  %p206_p3 = scmp.lt.s32.totalorder (!%p175_p2), %s343_s17, 63  ;;  %v350_v7 = vld [vmem:[%s436_s3] ss:$0 sm:$0xff] (!%p175_p2) }
   0xd   : > { %s439_s17 = smov (!%p206_p3, %s343_s17), 63 }
   0xe   : > { %s344_s18 = sshll.u32 %s439_s17, 2  ;;  %s346_s19 = sshll.u32 %s439_s17, 3 }
   0xf   : > { %s209_s22 = scalar_lea.vmem %s433_s0, %s344_s18  ;;  %s215_s25 = scalar_lea.vmem %s434_s1, %s346_s19 }
  0x10   : > { %v354_v0 = vld [vmem:[%s209_s22] sm:$0xff]   ;;  %v361_v1 = vld [vmem:[%s209_s22 + $0x8] sm:$0xff]   ;;  %v255_v14 = vld [vmem:[%s215_s25 + $0x10] sm:$0xff]  ;;  %s221_s6 = scalar_lea.vmem %s437_s4, %s346_s19 }
  0x11   : > { %v355_v3 = vunpack.c.l.bf16 %v354_v0  ;;  %v356_v4 = vunpack.c.h.bf16 %v354_v0  ;;  %v359_v5 = vunpack.c.l.bf16 %v361_v1  ;;  %v360_v6 = vunpack.c.h.bf16 %v361_v1  ;;  %v253_v9 = vld [vmem:[%s215_s25] sm:$0xff]  ;;  %v254_v13 = vld [vmem:[%s215_s25 + $0x8] sm:$0xff]  ;;  %v256_v15 = vld [vmem:[%s215_s25 + $0x18] sm:$0xff] }
  0x13   : > { %v238_v8 = vmul.f32 %v355_v3, %v349_v2  ;;  %v239_v10 = vmul.f32 %v356_v4, %v349_v2  ;;  %v240_v11 = vmul.f32 %v359_v5, %v349_v2  ;;  %v241_v12 = vmul.f32 %v360_v6, %v349_v2 }
  0x15   : > { %v249_v16 = vadd.f32 %v350_v7, %v238_v8  ;;  %v250_v17 = vadd.f32 %v350_v7, %v239_v10  ;;  %v251_v18 = vadd.f32 %v350_v7, %v240_v11  ;;  %v252_v19 = vadd.f32 %v350_v7, %v241_v12 }
  0x17   : > { %v257_v20 = vadd.f32 %v253_v9, %v249_v16  ;;  %v258_v21 = vadd.f32 %v254_v13, %v250_v17  ;;  %v259_v22 = vadd.f32 %v255_v14, %v251_v18  ;;  %v260_v23 = vadd.f32 %v256_v15, %v252_v19 }
  0x19   : > { %v261_v24 = vmax.f32 %v257_v20, 0.0  ;;  %v262_v25 = vmax.f32 %v258_v21, 0.0  ;;  %v263_v26 = vmax.f32 %v259_v22, 0.0  ;;  %v264_v27 = vmax.f32 %v260_v23, 0.0 }
  0x1b   : > { %266 = vst.msk [vmem:[%s221_s6] sm:$0xff] %vm265_vm0, %v261_v24  ;;  %267 = vst.msk [vmem:[%s221_s6 + $0x8] sm:$0xff] %vm265_vm0, %v262_v25 }
  0x1c   : > { %268 = vst.msk [vmem:[%s221_s6 + $0x10] sm:$0xff] %vm265_vm0, %v263_v26  ;;  %269 = vst.msk [vmem:[%s221_s6 + $0x18] sm:$0xff] %vm265_vm0, %v264_v27 }
  0x1d PF: > { %s14_s15 = sadd.s32 1, %s376_s15  }
  0x1e   : > { %p11_p4 = scmp.ge.s32.totalorder %s14_s15, 18  }
  0x20   :  { %13 = sbr.rel (!%p11_p4) target bundleno = 1 (0x1), region = 69 }

// kernel: bottleneck_forward.5
= control target key start
LH: loop header
LB: loop body
LE: loop exit
PB: predicated region body
PF: predicated region fallthrough
CT: control target
= control target key end

     0   :  { %s3818_s24 = smov 0   ;;  %s3820_s25 = smov 0   ;;  %s4505_s0 = inlined_call_operand.vmem [shape: bf16[2,16,16,128], index: 0, kind: input, shape index: {}, may-alias: {0,1,2}]   ;;  %s4506_s1 = inlined_call_operand.vmem [shape: bf16[2,16,16,128], index: 1, kind: input, shape index: {}, may-alias: {0,1,2}]   ;;  %s4507_s2 = inlined_call_operand.vmem [shape: bf16[2,16,16,128], index: 2, kind: input, shape index: {}, may-alias: {0,1,2}]   ;;  %s4508_s3 = inlined_call_operand.vmem [shape: f32[1,128], index: 3, kind: input, shape index: {}]   ;;  %s4509_s4 = inlined_call_operand.vmem [shape: f32[1,128], index: 4, kind: input, shape index: {}]   ;;  %s4510_s5 = inlined_call_operand.vmem [shape: bf16[1152,128], index: 5, kind: input, shape index: {}]   ;;  %s4511_s6 = inlined_call_operand.vmem [shape: bf16[2,16,16,128], index: 6, kind: output, shape index: {0}]   ;;  %s4512_s7 = inlined_call_operand.vmem [shape: f32[4,2,128], index: 7, kind: output, shape index: {1}]  }
   0x1   :  { %s3822_s26 = smov 0   ;;  %s3824_s27 = smov 0  }
   0x2   :  { %s3826_s28 = smov 0  }
   0x3 LB: > { %s27_s29 = sadd.s32 1, %s3768_s26  ;;  %s30_s30 = sadd.s32 1, %s3772_s27  ;;  %s3776_s28 = sphi %s3826_s28, %s18_s28   ;;  %s3772_s27 = sphi %s3824_s27, %s4519_s27   ;;  %s3768_s26 = sphi %s3822_s26, %s4518_s26   ;;  %s3764_s25 = sphi %s3820_s25, %s4517_s25   ;;  %s3760_s24 = sphi %s3818_s24, %s4516_s24  }
   0x4   : > { %p28_p0 = scmp.ge.s32.totalorder %s27_s29, 2  ;;  %p2818_p1 = scmp.ge.s32.totalorder %s3776_s28, 1 }
   0x5   : > { %p330_p2 = scmp.lt.s32.totalorder %s3776_s28, 5 }
   0x6   : > { %s4521_s29 = smov (%p28_p0, %s27_s29), 0  ;;  %s4523_s30 = smov (!%p28_p0, %s30_s30), %s3772_s27 }
   0x7   : > { %p331_p3 = pnand %p2818_p1, %p330_p2  ;;  %p32_p4 = scmp.ge.s32.totalorder %s4523_s30, 2 }
   0x8   : > { %v3666_v0 = vld [vmem:[%s4510_s5 + $0x100] sm:$0xff] (!%p331_p3)   ;;  %s3856_s10 = sshll.u32 (!%p331_p3), %s3760_s24, 3  ;;  %v3667_v1 = vld [vmem:[%s4510_s5 + $0x108] sm:$0xff] (!%p331_p3)   ;;  %p405_p5 = scmp.lt.s32.totalorder (!%p331_p3), %s3764_s25, 1  ;;  %v3669_v3 = vld [vmem:[%s4510_s5 + $0x110] sm:$0xff] (!%p331_p3)   ;;  %vm695_vm0 = vcmask (!%p331_p3), 1040384  }
   0x9   : > { %s4525_s30 = smov (%p32_p4, %s4523_s30), 0  ;;  %334 = sbr.rel (%p331_p3) target bundleno = 457 (0x1c9), region = 44 }
   0xa   : > { %3322 = vmatprep.subr.bf16.mxu0 (!%p331_p3), %v3666_v0  ;;  %v3668_v2 = vld [vmem:[%s4510_s5 + $0x40] sm:$0xff] (!%p331_p3)   ;;  %p407_p6 = scmp.lt.s32.totalorder (!%p331_p3), %s3856_s10, 15  ;;  %v3670_v4 = vld [vmem:[%s4510_s5 + $0x48] sm:$0xff] (!%p331_p3)   ;;  %v3672_v5 = vld [vmem:[%s4510_s5 + $0x50] sm:$0xff] (!%p331_p3)   ;;  %s2824_s14 = sadd.s32 (!%p331_p3), 4294967295, %s3856_s10  ;;  %vm1273_vm4 = vcmask (!%p331_p3), 1046528  }
   0xb   : > { %3323 = vmatpush3.bf16.msra.mxu0 (!%p331_p3), %v3666_v0  ;;  %3194 = vmatprep.subr.bf16.mxu1 (!%p331_p3), %v3668_v2  ;;  %v3671_v6 = vld [vmem:[%s4510_s5 + $0x118] sm:$0xff] (!%p331_p3)   ;;  %p417_p7 = scmp.gt.s32.totalorder (!%p331_p3), %s2824_s14, 0  ;;  %p2825_p8 = scmp.lt.s32.totalorder (!%p331_p3), %s2824_s14, 15  ;;  %v3673_v8 = vld [vmem:[%s4510_s5 + $0x120] sm:$0xff] (!%p331_p3)   ;;  %v3675_v12 = vld [vmem:[%s4510_s5 + $0x128] sm:$0xff] (!%p331_p3)  }
   0xc   : > { %3324 = vmatprep.subr.bf16.mxu0 (!%p331_p3), %v3667_v1  ;;  %3195 = vmatpush3.bf16.msra.mxu1 (!%p331_p3), %v3668_v2  ;;  %v3674_v7 = vld [vmem:[%s4510_s5 + $0x58] sm:$0xff] (!%p331_p3)   ;;  %v3676_v9 = vld [vmem:[%s4510_s5 + $0x60] sm:$0xff] (!%p331_p3)   ;;  %p583_p9 = scmp.gt.s32.totalorder (!%p331_p3), %s3760_s24, 0  ;;  %v3678_v19 = vld [vmem:[%s4510_s5 + $0x68] sm:$0xff] (!%p331_p3)   ;;  %vm696_vm1 = vsmask.f32 (!%p331_p3), 256 }
   0xd   : > { %3196 = vmatprep.subr.bf16.mxu1 (!%p331_p3), %v3670_v4  ;;  %v3907_v11 = vld [vmem:[%s4508_s3] ss:$0 sm:$0xff] (!%p331_p3)  ;;  %v3677_v22 = vld [vmem:[%s4510_s5 + $0x130] sm:$0xff] (!%p331_p3)   ;;  %v3679_v36 = vld [vmem:[%s4510_s5 + $0x138] sm:$0xff] (!%p331_p3)   ;;  %vm862_vm2 = vsmask.f32 (!%p331_p3), 7424 }
   0xe   : > { %v3915_v15 = vld [vmem:[%s4509_s4] ss:$0 sm:$0xff] (!%p331_p3)  ;;  %v3680_v25 = vld [vmem:[%s4510_s5 + $0x70] sm:$0xff] (!%p331_p3)   ;;  %v3682_v51 = vld [vmem:[%s4510_s5 + $0x78] sm:$0xff] (!%p331_p3)   ;;  %p589_p11 = scmp.lt.s32.totalorder (!%p331_p3), %s3760_s24, 1 }
   0xf   : > { %3325 = vmatpush3.bf16.msra.mxu0 (!%p331_p3), %v3667_v1  ;;  %v3961_v59 = vld [vmem:[%s4510_s5 + $0x140] sm:$0xff] (!%p331_p3)   ;;  %vm3965_vm3 = vmand (!%p331_p3), %vm695_vm0, %vm696_vm1  ;;  %v3714_v63 = vld [vmem:[%s4510_s5 + $0xb8] sm:$0xff] (!%p331_p3)  }
  0x10   : > { %s406_s17 = scalar_select %p405_p5, %s3764_s25, 1  ;;  %3326 = vmatprep.subr.bf16.mxu0 %v3669_v3  ;;  %3197 = vmatpush3.bf16.msra.mxu1 %v3670_v4 }
  0x11   : > { %s408_s20 = scalar_select %p407_p6, %s3856_s10, 15  ;;  %3198 = vmatprep.subr.bf16.mxu1 %v3672_v5 }
  0x12   : > { %s3874_s21 = sshll.u32 %s406_s17, 5  ;;  %s4527_s14 = smov (!%p417_p7, %s2824_s14), 0 }
  0x13   : > { %s2820_s8 = sshll.u32 %s408_s20, 1  ;;  %3327 = vmatpush3.bf16.msra.mxu0 %v3669_v3  ;;  %s4529_s14 = smov (!%p2825_p8, %s4527_s14), 15 }
  0x14   : > { %s3880_s9 = sadd.s32 %s3874_s21, %s2820_s8  ;;  %3328 = vmatprep.subr.bf16.mxu0 %v3671_v6  ;;  %3199 = vmatpush3.bf16.msra.mxu1 %v3672_v5  ;;  %s2830_s20 = sshll.u32 %s4529_s14, 1 }
  0x15   : > { %s2822_s13 = sshll.u32 %s3880_s9, 2  ;;  %3200 = vmatprep.subr.bf16.mxu1 %v3674_v7  ;;  %s425_s8 = sadd.s32 %s2830_s20, %s3874_s21 }
  0x16   : > { %s3895_s19 = scalar_lea.vmem %s4505_s0, %s2822_s13  ;;  %s2832_s14 = sshll.u32 %s425_s8, 2 }
  0x17   : > { %3329 = vmatpush3.bf16.msra.mxu0 %v3671_v6  ;;  %v2957_v10 = vld [vmem:[%s3895_s19] sm:$0xff]   ;;  %v3036_v16 = vld [vmem:[%s3895_s19 + $0x8] sm:$0xff]   ;;  %s427_s20 = scalar_lea.vmem %s4506_s1, %s2832_s14  ;;  %v3037_v31 = vld [vmem:[%s3895_s19 + $0x10] sm:$0xff]   ;;  %s2844_s9 = sshll.u32 %s3764_s25, 1 }
  0x18   : > { %3330 = vmatprep.subr.bf16.mxu0 %v3673_v8  ;;  %v2958_v13 = vunpack.c.l.bf16 %v2957_v10  ;;  %v2959_v14 = vunpack.c.h.bf16 %v2957_v10  ;;  %3201 = vmatpush3.bf16.msra.mxu1 %v3674_v7  ;;  %v2962_v17 = vunpack.c.l.bf16 %v3036_v16  ;;  %v2963_v18 = vunpack.c.h.bf16 %v3036_v16  ;;  %v2989_v30 = vld [vmem:[%s427_s20] sm:$0xff]   ;;  %s584_s22 = scalar_select %p583_p9, 1, 0  ;;  %v3038_v48 = vld [vmem:[%s3895_s19 + $0x18] sm:$0xff]  }
  0x19   : > { %3202 = vmatprep.subr.bf16.mxu1 %v3676_v9  ;;  %v2990_v34 = vunpack.c.l.bf16 %v2989_v30  ;;  %v2991_v35 = vunpack.c.h.bf16 %v2989_v30  ;;  %v2966_v39 = vunpack.c.l.bf16 %v3037_v31  ;;  %v2967_v40 = vunpack.c.h.bf16 %v3037_v31  ;;  %s433_s20 = sadd.s32 8, %s3856_s10 }
  0x1a   : > { %v508_v20 = vmul.f32 %v2958_v13, %v3907_v11  ;;  %v509_v21 = vmul.f32 %v2959_v14, %v3907_v11  ;;  %v510_v23 = vmul.f32 %v2962_v17, %v3907_v11  ;;  %v511_v24 = vmul.f32 %v2963_v18, %v3907_v11  ;;  %s585_s11 = scvt.s32.f32 %s584_s22  ;;  %p4164_p10 = scmp.lt.s32.totalorder %s433_s20, 15 }
  0x1b   : > { %3331 = vmatpush3.bf16.msra.mxu0 %v3673_v8  ;;  %v567_v42 = vmul.f32 %v2990_v34, %v3907_v11  ;;  %v568_v43 = vmul.f32 %v2991_v35, %v3907_v11  ;;  %v512_v46 = vmul.f32 %v2966_v39, %v3907_v11  ;;  %v513_v47 = vmul.f32 %v2967_v40, %v3907_v11  ;;  %v3976_v8 = vld [vmem:[%s4510_s5] sm:$0xff]   ;;  %s4201_s10 = scalar_select %p589_p11, 1, 0 }
  0x1c   : > { %3332 = vmatprep.subr.bf16.mxu0 %v3675_v12  ;;  %v531_v26 = vadd.f32 %v3915_v15, %v508_v20  ;;  %v532_v27 = vadd.f32 %v3915_v15, %v509_v21  ;;  %3203 = vmatpush3.bf16.msra.mxu1 %v3676_v9  ;;  %v533_v28 = vadd.f32 %v3915_v15, %v510_v23  ;;  %v586_v45 = vstv %s585_s11  ;;  %s4531_s20 = smov (!%p4164_p10, %s433_s20), 15 }
  0x1d   : > { %v534_v29 = vadd.f32 %v3915_v15, %v511_v24  ;;  %3204 = vmatprep.subr.bf16.mxu1 %v3678_v19  ;;  %v569_v52 = vadd.f32 %v3915_v15, %v567_v42  ;;  %v570_v53 = vadd.f32 %v3915_v15, %v568_v43  ;;  %v535_v56 = vadd.f32 %v3915_v15, %v512_v46  ;;  %s4533_s20 = smov (!%p4164_p10, %s4531_s20), 15  ;;  %s591_s15 = scvt.s32.f32 %s4201_s10 }
  0x1e   : > { %v547_v32 = vmax.f32 %v531_v26, 0.0  ;;  %v548_v33 = vmax.f32 %v532_v27, 0.0  ;;  %v549_v37 = vmax.f32 %v533_v28, 0.0  ;;  %v536_v57 = vadd.f32 %v3915_v15, %v513_v47  ;;  %s2837_s22 = sshll.u32 %s4533_s20, 1  ;;  %s4457_s10 = scalar_lea.vmem %s4511_s6, %s2822_s13 }
  0x1f   : > { %3333 = vmatpush3.bf16.msra.mxu0 %v3675_v12  ;;  %v550_v38 = vmax.f32 %v534_v29, 0.0  ;;  %v571_v60 = vmax.f32 %v569_v52, 0.0  ;;  %v572_v61 = vmax.f32 %v570_v53, 0.0  ;;  %v2970_v62 = vunpack.c.l.bf16 %v3038_v48  ;;  %s442_s23 = sadd.s32 %s2837_s22, %s3874_s21  ;;  %s461_s13 = sadd.s32 %s3760_s24, %s2844_s9 }
  0x20   : > { %3334 = vmatprep.subr.bf16.mxu0 %v3677_v22  ;;  %v596_v41 = vpack.c.bf16 %v548_v33, %v547_v32  ;;  %3205 = vmatpush3.bf16.msra.mxu1 %v3678_v19  ;;  %v551_v1 = vmax.f32 %v535_v56, 0.0  ;;  %v552_v2 = vmax.f32 %v536_v57, 0.0  ;;  %v2971_v3 = vunpack.c.h.bf16 %v3038_v48  ;;  %v3039_v19 = vld [vmem:[%s3895_s19 + $0x20] sm:$0xff]   ;;  %s2839_s8 = sshll.u32 %s442_s23, 2  ;;  %p462_p12 = scmp.lt.s32.totalorder %s461_s13, 3 }
  0x21   : > { %v597_v44 = vpack.c.bf16 %v550_v38, %v549_v37  ;;  %3206 = vmatprep.subr.bf16.mxu1 %v3680_v25  ;;  %v587_v6 = vmul.f32 %v586_v45, %v571_v60  ;;  %v588_v7 = vmul.f32 %v586_v45, %v572_v61  ;;  %v514_v18 = vmul.f32 %v2970_v62, %v3907_v11  ;;  %v3683_v37 = vld [vmem:[%s4510_s5 + $0x148] sm:$0xff]   ;;  %s444_s20 = scalar_lea.vmem %s4507_s2, %s2839_s8 }
  0x22   : > { %v613_v49 = vshrl.u32 %v596_v41, 16  ;;  %v616_v50 = vshll.u32 %v596_v41, 16  ;;  %v598_v13 = vpack.c.bf16 %v552_v2, %v551_v1  ;;  %v515_v34 = vmul.f32 %v2971_v3, %v3907_v11  ;;  %v3040_v45 = vld [vmem:[%s3895_s19 + $0x28] sm:$0xff]   ;;  %v3685_v2 = vld [vmem:[%s4510_s5 + $0x150] sm:$0xff]   ;;  %s4535_s13 = smov (!%p462_p12, %s461_s13), 3 }
  0x23   : > { %3335 = vmatpush3.bf16.msra.mxu0 %v3677_v22  ;;  %v620_v54 = vshrl.u32 %v597_v44, 16  ;;  %v623_v55 = vshll.u32 %v597_v44, 16  ;;  %v595_v17 = vpack.c.bf16 %v588_v7, %v587_v6  ;;  %v537_v35 = vadd.f32 %v3915_v15, %v514_v18  ;;  %s2845_s25 = sshll.u32 %s4535_s13, 1 }
  0x24   : > { %3336 = vmatprep.subr.bf16.mxu0 %v3679_v36  ;;  %v615_v58 = vrot.slane %v613_v49, 7  ;;  %3207 = vmatpush3.bf16.msra.mxu1 %v3680_v25  ;;  %v627_v30 = vshrl.u32 %v598_v13, 16  ;;  %v630_v31 = vshll.u32 %v598_v13, 16  ;;  %v2974_v39 = vunpack.c.l.bf16 %v3039_v19  ;;  %s465_s24 = scalar_lea.vmem %s4512_s7, %s2845_s25 }
  0x25   : > { %v622_v0 = vrot.slane %v620_v54, 7  ;;  %3208 = vmatprep.subr.bf16.mxu1 %v3682_v51  ;;  %v606_v27 = vshrl.u32 %v595_v17, 16  ;;  %v609_v29 = vshll.u32 %v595_v17, 16  ;;  %v2975_v40 = vunpack.c.h.bf16 %v3039_v19  ;;  %v3041_v54 = vld [vmem:[%s3895_s19 + $0x30] sm:$0xff]  }
  0x26   : > { %v618_v4 = vor.u32 %v616_v50, %v615_v58  ;;  %v3971_v5 = vsel %vm3965_vm3, %v615_v58, 0  ;;  %v629_v38 = vrot.slane %v627_v30, 7  ;;  %v538_v44 = vadd.f32 %v3915_v15, %v515_v34 }
  0x27   : > { %3337 = vmatpush3.bf16.msra.mxu0 %v3679_v36  ;;  %v883_v9 = vshll.u32 %v3971_v5, 16  ;;  %v625_v10 = vor.u32 %v623_v55, %v622_v0  ;;  %v3981_v12 = vsel %vm3965_vm3, %v622_v0, 0  ;;  %v608_v33 = vrot.slane %v606_v27, 7 }
  0x28   : > { %v3985_v14 = vsel %vm3965_vm3, 0, %v618_v4  ;;  %v895_v16 = vshll.u32 %v3981_v12, 16  ;;  %3354 = vmatprep.subr.bf16.mxu0 %v3961_v59  ;;  %3209 = vmatpush3.bf16.msra.mxu1 %v3682_v51  ;;  %v632_v48 = vor.u32 %v630_v31, %v629_v38  ;;  %v4015_v49 = vsel %vm3965_vm3, %v629_v38, 0 }
  0x29   : > { %v876_v20 = vshrl.u32 %v3985_v14, 16  ;;  %v878_v21 = vshll.u32 %v3985_v14, 16  ;;  %v885_v22 = vrot.slane %v883_v9, 1  ;;  %v3995_v23 = vsel %vm3965_vm3, 0, %v625_v10  ;;  %3226 = vmatprep.subr.bf16.mxu1 %v3976_v8 }
  0x2a   : > { %v888_v24 = vshrl.u32 %v3995_v23, 16  ;;  %v890_v25 = vshll.u32 %v3995_v23, 16  ;;  %v897_v26 = vrot.slane %v895_v16, 1  ;;  %v611_v42 = vor.u32 %v609_v29, %v608_v33 }
  0x2b   : > { %v880_v28 = vrot.slane %v878_v21, 1  ;;  %v4007_v43 = vsel %vm3965_vm3, %v608_v33, 0  ;;  %v907_v52 = vshll.u32 %v4015_v49, 16  ;;  %v553_v53 = vmax.f32 %v537_v35, 0.0  ;;  %v3688_v35 = vld [vmem:[%s4510_s5 + $0x10] sm:$0xff]  }
  0x2c   : > { %v892_v32 = vrot.slane %v890_v25, 1  ;;  %v871_v47 = vshll.u32 %v4007_v43, 16  ;;  %v4022_v51 = vsel %vm3965_vm3, 0, %v611_v42  ;;  %v4031_v58 = vsel %vm3965_vm3, 0, %v632_v48  ;;  %v3042_v25 = vld [vmem:[%s3895_s19 + $0x38] sm:$0xff]  }
  0x2d   : > { %v881_v36 = vor.u32 %v880_v28, %v876_v20  ;;  %v864_v55 = vshrl.u32 %v4022_v51, 16  ;;  %v866_v56 = vshll.u32 %v4022_v51, 16  ;;  %v900_v60 = vshrl.u32 %v4031_v58, 16 }
  0x2e   : > { %v893_v41 = vor.u32 %v892_v32, %v888_v24  ;;  %v873_v57 = vrot.slane %v871_v47, 1  ;;  %v902_v61 = vshll.u32 %v4031_v58, 16  ;;  %v909_v62 = vrot.slane %v907_v52, 1  ;;  %v3687_v32 = vld [vmem:[%s4510_s5 + $0x158] sm:$0xff]  }
  0x2f   : > { %v886_v46 = vsel %vm862_vm2, %v881_v36, %v885_v22  ;;  %v554_v0 = vmax.f32 %v538_v44, 0.0  ;;  %v868_v1 = vrot.slane %v866_v56, 1  ;;  %v516_v3 = vmul.f32 %v2974_v39, %v3907_v11  ;;  %v3686_v22 = vld [vmem:[%s4510_s5 + $0x8] sm:$0xff]  }
  0x30   : > { %3338 = vmatprep.mubr.bf16.mxu0 %v886_v46  ;;  %v4018_v50 = vsel %vm862_vm2, %v893_v41, %v897_v26  ;;  %v517_v4 = vmul.f32 %v2975_v40, %v3907_v11  ;;  %v2978_v6 = vunpack.c.l.bf16 %v3040_v45  ;;  %v904_v7 = vrot.slane %v902_v61, 1 }
  0x31   : > { %3339 = vmatmul.mubr.bf16.vlgmr.msra.gmra.mrb[0].mxu0 %v4018_v50  ;;  %v2979_v9 = vunpack.c.h.bf16 %v3040_v45  ;;  %v2982_v10 = vunpack.c.l.bf16 %v3041_v54  ;;  %v869_v13 = vor.u32 %v868_v1, %v864_v55  ;;  %v539_v16 = vadd.f32 %v3915_v15, %v516_v3  ;;  %v3690_v1 = vld [vmem:[%s4510_s5 + $0x18] sm:$0xff]  }
  0x32   : > { %3355 = vmatpush3.bf16.msra.mxu0 %v3961_v59  ;;  %v599_v59 = vpack.c.bf16 %v554_v0, %v553_v53  ;;  %v540_v17 = vadd.f32 %v3915_v15, %v517_v4  ;;  %v518_v18 = vmul.f32 %v2978_v6, %v3907_v11  ;;  %v905_v19 = vor.u32 %v904_v7, %v900_v60 }
  0x33   : > { %3356 = vmatprep.subr.bf16.mxu0 %v3683_v37  ;;  %v519_v24 = vmul.f32 %v2979_v9, %v3907_v11  ;;  %v874_v26 = vsel %vm862_vm2, %v869_v13, %v873_v57  ;;  %v555_v27 = vmax.f32 %v539_v16, 0.0  ;;  %v2983_v34 = vunpack.c.h.bf16 %v3041_v54 }
  0x34   : > { %v634_v20 = vshrl.u32 %v599_v59, 16  ;;  %v637_v21 = vshll.u32 %v599_v59, 16  ;;  %v556_v28 = vmax.f32 %v540_v17, 0.0  ;;  %v541_v29 = vadd.f32 %v3915_v15, %v518_v18  ;;  %3210 = vmatprep.mubr.bf16.mxu1 %v874_v26  ;;  %v3692_v26 = vld [vmem:[%s4510_s5 + $0x20] sm:$0xff]  }
  0x35   : > { %v4052_v30 = vsel %vm862_vm2, %v905_v19, %v909_v62  ;;  %v542_v33 = vadd.f32 %v3915_v15, %v519_v24  ;;  %3211 = vmatmul.mubr.bf16.vlgmr.msra.gmra.mrb[0].mxu1 %v886_v46  ;;  %v520_v38 = vmul.f32 %v2982_v10, %v3907_v11  ;;  %v2986_v39 = vunpack.c.l.bf16 %v3042_v25 }
  0x36   : > { %3357 = vmatpush3.bf16.msra.mxu0 %v3683_v37  ;;  %v636_v31 = vrot.slane %v634_v20, 7  ;;  %3342 = vmatprep.mubr.bf16.mxu0 %v4052_v30  ;;  %v600_v36 = vpack.c.bf16 %v556_v28, %v555_v27  ;;  %v557_v37 = vmax.f32 %v541_v29, 0.0  ;;  %v521_v44 = vmul.f32 %v2983_v34, %v3907_v11 }
  0x37   : > { %3358 = vmatprep.subr.bf16.mxu0 %v3685_v2  ;;  %3227 = vmatpush3.bf16.msra.mxu1 %v3976_v8  ;;  %v558_v42 = vmax.f32 %v542_v33, 0.0  ;;  %v3689_v8 = vld [vmem:[%s4510_s5 + $0x160] sm:$0xff]   ;;  %v543_v48 = vadd.f32 %v3915_v15, %v520_v38  ;;  %v2987_v55 = vunpack.c.h.bf16 %v3042_v25  ;;  %v522_v9 = vmul.f32 %v2986_v39, %v3907_v11 }
  0x38   : > { %v639_v40 = vor.u32 %v637_v21, %v636_v31  ;;  %v4066_v41 = vsel %vm3965_vm3, %v636_v31, 0  ;;  %3228 = vmatprep.subr.bf16.mxu1 %v3686_v22  ;;  %3214 = vmatprep.mubr.bf16.mxu1 %v4018_v50  ;;  %v641_v46 = vshrl.u32 %v600_v36, 16  ;;  %v644_v47 = vshll.u32 %v600_v36, 16 }
  0x39   : > { %v919_v45 = vshll.u32 %v4066_v41, 16  ;;  %v601_v53 = vpack.c.bf16 %v558_v42, %v557_v37  ;;  %v544_v54 = vadd.f32 %v3915_v15, %v521_v44  ;;  %v559_v3 = vmax.f32 %v543_v48, 0.0 }
  0x3a   : > { %3359 = vmatpush3.bf16.msra.mxu0 %v3685_v2  ;;  %v4077_v52 = vsel %vm3965_vm3, 0, %v639_v40  ;;  %v643_v61 = vrot.slane %v641_v46, 7  ;;  %v3691_v2 = vld [vmem:[%s4510_s5 + $0x168] sm:$0xff]   ;;  %v523_v17 = vmul.f32 %v2987_v55, %v3907_v11  ;;  %v545_v20 = vadd.f32 %v3915_v15, %v522_v9 }
  0x3b   : > { %3360 = vmatprep.subr.bf16.mxu0 %v3687_v32  ;;  %v912_v56 = vshrl.u32 %v4077_v52, 16  ;;  %v914_v57 = vshll.u32 %v4077_v52, 16  ;;  %v921_v60 = vrot.slane %v919_v45, 1  ;;  %3229 = vmatpush3.bf16.msra.mxu1 %v3686_v22  ;;  %v648_v62 = vshrl.u32 %v601_v53, 16  ;;  %v3694_v45 = vld [vmem:[%s4510_s5 + $0x28] sm:$0xff]  }
  0x3c   : > { %v651_v0 = vshll.u32 %v601_v53, 16  ;;  %v560_v4 = vmax.f32 %v544_v54, 0.0  ;;  %3230 = vmatprep.subr.bf16.mxu1 %v3688_v35  ;;  %v646_v7 = vor.u32 %v644_v47, %v643_v61  ;;  %v4090_v59 = vsel %vm3965_vm3, %v643_v61, 0  ;;  %v3695_v53 = vld [vmem:[%s4510_s5 + $0x178] sm:$0xff]  }
  0x3d   : > { %v916_v6 = vrot.slane %v914_v57, 1  ;;  %v931_v10 = vshll.u32 %v4090_v59, 16  ;;  %v650_v13 = vrot.slane %v648_v62, 7  ;;  %3215 = vmatmul.mubr.bf16.gmra.mrb[4].mxu1 %v4052_v30  ;;  %v546_v36 = vadd.f32 %v3915_v15, %v523_v17 }
  0x3e   : > { %3361 = vmatpush3.bf16.msra.mxu0 %v3687_v32  ;;  %v602_v16 = vpack.c.bf16 %v560_v4, %v559_v3  ;;  %v4098_v19 = vsel %vm3965_vm3, 0, %v646_v7  ;;  %v3693_v32 = vld [vmem:[%s4510_s5 + $0x170] sm:$0xff]   ;;  %v561_v40 = vmax.f32 %v545_v20, 0.0  ;;  %v4158_v4 = vld [vmem:[%s4510_s5 + $0x180] sm:$0xff]  }
  0x3f   : > { %3362 = vmatprep.subr.bf16.mxu0 %v3689_v8  ;;  %v917_v18 = vor.u32 %v916_v6, %v912_v56  ;;  %3231 = vmatpush3.bf16.msra.mxu1 %v3688_v35  ;;  %v924_v21 = vshrl.u32 %v4098_v19, 16  ;;  %v926_v22 = vshll.u32 %v4098_v19, 16  ;;  %v933_v24 = vrot.slane %v931_v10, 1  ;;  %v3696_v3 = vld [vmem:[%s4510_s5 + $0x30] sm:$0xff]  }
  0x40   : > { %v653_v25 = vor.u32 %v651_v0, %v650_v13  ;;  %v4111_v28 = vsel %vm3965_vm3, %v650_v13, 0  ;;  %3232 = vmatprep.subr.bf16.mxu1 %v3690_v1  ;;  %v655_v29 = vshrl.u32 %v602_v16, 16  ;;  %v658_v31 = vshll.u32 %v602_v16, 16 }
  0x41   : > { %v4107_v27 = vsel %vm862_vm2, %v917_v18, %v921_v60  ;;  %v928_v33 = vrot.slane %v926_v22, 1  ;;  %v943_v35 = vshll.u32 %v4111_v28, 16  ;;  %v562_v44 = vmax.f32 %v546_v36, 0.0  ;;  %v3698_v18 = vld [vmem:[%s4510_s5 + $0x38] sm:$0xff]   ;;  %v3702_v36 = vld [vmem:[%s4510_s5 + $0x88] sm:$0xff]  }
  0x42   : > { %3363 = vmatpush3.bf16.msra.mxu0 %v3689_v8  ;;  %v4119_v34 = vsel %vm3965_vm3, 0, %v653_v25  ;;  %3218 = vmatprep.mubr.bf16.mxu1 %v4107_v27  ;;  %v657_v39 = vrot.slane %v655_v29, 7  ;;  %v3700_v25 = vld [vmem:[%s4510_s5 + $0x80] sm:$0xff]   ;;  %v1278_v29 = vrot.slane %v3971_v5, 1 }
  0x43   : > { %3364 = vmatprep.subr.bf16.mxu0 %v3691_v2  ;;  %3343 = vmatmul.mubr.bf16.gmra.mrb[4].mxu0 %v4107_v27  ;;  %v936_v37 = vshrl.u32 %v4119_v34, 16  ;;  %v938_v38 = vshll.u32 %v4119_v34, 16  ;;  %v929_v42 = vor.u32 %v928_v33, %v924_v21  ;;  %v945_v47 = vrot.slane %v943_v35, 1 }
  0x44   : > { %3233 = vmatpush3.bf16.msra.mxu1 %v3690_v1  ;;  %v660_v8 = vor.u32 %v658_v31, %v657_v39  ;;  %v4131_v48 = vsel %vm3965_vm3, %v657_v39, 0  ;;  %v603_v56 = vpack.c.bf16 %v562_v44, %v561_v40  ;;  %v1283_v39 = vrot.slane %v4031_v58, 1 }
  0x45   : > { %v940_v46 = vrot.slane %v938_v38, 1  ;;  %3234 = vmatprep.subr.bf16.mxu1 %v3692_v26  ;;  %v4137_v54 = vsel %vm862_vm2, %v929_v42, %v933_v24  ;;  %v955_v55 = vshll.u32 %v4131_v48, 16  ;;  %v1280_v38 = vrot.slane %v3995_v23, 1  ;;  %v2993_v42 = vld [vmem:[%s444_s20] sm:$0xff]  }
  0x46   : > { %3365 = vmatpush3.bf16.msra.mxu0 %v3691_v2  ;;  %3346 = vmatprep.mubr.bf16.mxu0 %v4137_v54  ;;  %v4144_v60 = vsel %vm3965_vm3, 0, %v660_v8  ;;  %v662_v0 = vshrl.u32 %v603_v56, 16  ;;  %v665_v2 = vshll.u32 %v603_v56, 16  ;;  %v1284_v40 = vrot.slane %v4015_v49, 1  ;;  %v3699_v49 = vld [vmem:[%s4510_s5 + $0x188] sm:$0xff]  }
  0x47   : > { %3366 = vmatprep.subr.bf16.mxu0 %v3693_v32  ;;  %v941_v57 = vor.u32 %v940_v46, %v936_v37  ;;  %3219 = vmatmul.mubr.bf16.gmra.mrb[8].mxu1 %v4137_v54  ;;  %v948_v61 = vshrl.u32 %v4144_v60, 16  ;;  %v950_v62 = vshll.u32 %v4144_v60, 16  ;;  %v957_v7 = vrot.slane %v955_v55, 1  ;;  %v3706_v55 = vld [vmem:[%s4510_s5 + $0x98] sm:$0xff]  }
  0x48   : > { %3235 = vmatpush3.bf16.msra.mxu1 %v3692_v26  ;;  %v664_v9 = vrot.slane %v662_v0, 7  ;;  %v1277_v26 = vrot.slane %v3985_v14, 1  ;;  %v1281_v37 = vrot.slane %v3981_v12, 1  ;;  %v3704_v12 = vld [vmem:[%s4510_s5 + $0x90] sm:$0xff]   ;;  %v2994_v44 = vunpack.c.l.bf16 %v2993_v42 }
  0x49   : > { %v4150_v1 = vsel %vm862_vm2, %v941_v57, %v945_v47  ;;  %3236 = vmatprep.subr.bf16.mxu1 %v3694_v45  ;;  %v952_v6 = vrot.slane %v950_v62, 1  ;;  %v3701_v62 = vld [vmem:[%s4510_s5 + $0x190] sm:$0xff]   ;;  %v592_v0 = vstv %s591_s15 }
  0x4a   : > { %3367 = vmatpush3.bf16.msra.mxu0 %v3693_v32  ;;  %3222 = vmatprep.mubr.bf16.mxu1 %v4150_v1  ;;  %v667_v13 = vor.u32 %v665_v2, %v664_v9  ;;  %v4170_v16 = vsel %vm3965_vm3, %v664_v9, 0  ;;  %v4204_v35 = vsel %vm1273_vm4, %v1277_v26, %v1278_v29  ;;  %v4229_v46 = vsel %vm1273_vm4, %v1280_v38, %v1281_v37  ;;  %v3705_v29 = vld [vmem:[%s4510_s5 + $0x1a0] sm:$0xff]  }
  0x4b   : > { %3368 = vmatprep.subr.bf16.mxu0 %v3695_v53  ;;  %3347 = vmatmul.mubr.bf16.gmra.mrb[8].mxu0 %v4150_v1  ;;  %v953_v10 = vor.u32 %v952_v6, %v948_v61  ;;  %v1636_v17 = vshll.u32 %v4170_v16, 16  ;;  %v577_v47 = vmul.f32 %v2994_v44, %v3907_v11  ;;  %v1287_v61 = vrot.slane %v4066_v41, 1 }
  0x4c   : > { %3237 = vmatpush3.bf16.msra.mxu1 %v3694_v45  ;;  %v4182_v21 = vsel %vm3965_vm3, 0, %v667_v13  ;;  %v2995_v45 = vunpack.c.h.bf16 %v2993_v42  ;;  %v1290_v6 = vrot.slane %v4090_v59, 1  ;;  %v3703_v59 = vld [vmem:[%s4510_s5 + $0x198] sm:$0xff]   ;;  %v1274_v37 = vrot.slane %v4022_v51, 1  ;;  %v3707_v42 = vld [vmem:[%s4510_s5 + $0x1a8] sm:$0xff]  }
  0x4d   : > { %3238 = vmatprep.subr.bf16.mxu1 %v3696_v3  ;;  %v4178_v20 = vsel %vm862_vm2, %v953_v10, %v957_v7  ;;  %v1629_v22 = vshrl.u32 %v4182_v21, 16  ;;  %v1631_v24 = vshll.u32 %v4182_v21, 16  ;;  %v1638_v32 = vrot.slane %v1636_v17, 1 }
  0x4e   : > { %3369 = vmatpush3.bf16.msra.mxu0 %v3695_v53  ;;  %3350 = vmatprep.mubr.bf16.mxu0 %v4178_v20  ;;  %v578_v8 = vmul.f32 %v2995_v45, %v3907_v11  ;;  %v4237_v53 = vsel %vm1273_vm4, %v1283_v39, %v1284_v40  ;;  %v579_v56 = vadd.f32 %v3915_v15, %v577_v47  ;;  %v1286_v11 = vrot.slane %v4077_v52, 1 }
  0x4f   : > { %3386 = vmatprep.subr.bf16.mxu0 %v4158_v4  ;;  %3223 = vmatmul.mubr.bf16.gmra.mrb[12].mxu1 %v4178_v20  ;;  %v1633_v31 = vrot.slane %v1631_v24, 1  ;;  %v1292_v24 = vrot.slane %v4119_v34, 1  ;;  %v1275_v38 = vrot.slane %v4007_v43, 1  ;;  %v1804_v45 = vrot.slane %v4182_v21, 1 }
  0x50   : > { %3239 = vmatpush3.bf16.msra.mxu1 %v3696_v3  ;;  %3242 = vmatprep.mubr.bf16.mxu1 %v4022_v51  ;;  %v580_v57 = vadd.f32 %v3915_v15, %v578_v8  ;;  %v581_v2 = vmax.f32 %v579_v56, 0.0  ;;  %v1289_v15 = vrot.slane %v4098_v19, 1  ;;  %v4260_v9 = vsel %vm1273_vm4, %v1286_v11, %v1287_v61  ;;  %v3709_v8 = vld [vmem:[%s4510_s5 + $0x1b0] sm:$0xff]   ;;  %v3718_v56 = vld [vmem:[%s4510_s5 + $0xc8] sm:$0xff]  }
  0x51   : > { %3240 = vmatprep.subr.bf16.mxu1 %v3698_v18  ;;  %v1634_v33 = vor.u32 %v1633_v31, %v1629_v22  ;;  %v3710_v22 = vld [vmem:[%s4510_s5 + $0xa8] sm:$0xff]   ;;  %v1295_v31 = vrot.slane %v4144_v60, 1  ;;  %v1276_v51 = vsel %vm1273_vm4, %v1274_v37, %v1275_v38  ;;  %v1805_v47 = vrot.slane %v4170_v16, 1  ;;  %v3711_v16 = vld [vmem:[%s4510_s5 + $0x1b8] sm:$0xff]   ;;  %v3720_v11 = vld [vmem:[%s4510_s5 + $0xd0] sm:$0xff]  }
  0x52   : > { %v582_v3 = vmax.f32 %v580_v57, 0.0  ;;  %v593_v41 = vmul.f32 %v592_v0, %v581_v2  ;;  %v4266_v13 = vsel %vm1273_vm4, %v1289_v15, %v1290_v6  ;;  %v3713_v57 = vld [vmem:[%s4510_s5 + $0x1c0] sm:$0xff]   ;;  %v3715_v61 = vld [vmem:[%s4510_s5 + $0x1c8] sm:$0xff]   ;;  %v3719_v2 = vld [vmem:[%s4510_s5 + $0x1d8] sm:$0xff]  }
  0x53   : > { %v4210_v5 = vsel %vm862_vm2, %v1634_v33, %v1638_v32  ;;  %v1296_v32 = vrot.slane %v4131_v48, 1  ;;  %v3721_v15 = vld [vmem:[%s4510_s5 + $0x1e0] sm:$0xff]   ;;  %v3728_v6 = vld [vmem:[%s4510_s5 + $0xf0] sm:$0xff]  }
  0x54   : > { %3241 = vmatpush3.bf16.msra.mxu1 %v3698_v18  ;;  %3351 = vmatmul.mubr.bf16.gmra.mrb[12].mxu0 %v4210_v5  ;;  %v594_v7 = vmul.f32 %v592_v0, %v582_v3  ;;  %v3724_v0 = vld [vmem:[%s4510_s5 + $0xe0] sm:$0xff]   ;;  %v3726_v3 = vld [vmem:[%s4510_s5 + $0xe8] sm:$0xff]  }
  0x55   : > { %3258 = vmatprep.subr.bf16.mxu1 %v3700_v25  ;;  %3370 = vmatprep.mubr.bf16.mxu0 %v4204_v35 }
  0x56   : > { %v604_v10 = vpack.c.bf16 %v594_v7, %v593_v41  ;;  %v3723_v41 = vld [vmem:[%s4510_s5 + $0x1e8] sm:$0xff]   ;;  %v3730_v7 = vld [vmem:[%s4510_s5 + $0xf8] sm:$0xff]  }
  0x57   : > { %3243 = vmatmul.mubr.bf16.vlgmr.msra.gmra.mrb[0].mxu1 %v3985_v14 }
  0x58   : > { %3259 = vmatpush3.bf16.msra.mxu1 %v3700_v25  ;;  %3246 = vmatprep.mubr.bf16.mxu1 %v3995_v23  ;;  %v669_v17 = vshrl.u32 %v604_v10, 16  ;;  %v672_v18 = vshll.u32 %v604_v10, 16  ;;  %v1293_v25 = vrot.slane %v4111_v28, 1  ;;  %v3712_v28 = vld [vmem:[%s4510_s5 + $0xb0] sm:$0xff]   ;;  %v3727_v10 = vld [vmem:[%s4510_s5 + $0x1f8] sm:$0xff]  }
  0x59   : > { %3260 = vmatprep.subr.bf16.mxu1 %v3702_v36 }
  0x5a   : > { %v671_v26 = vrot.slane %v669_v17, 7  ;;  %v4293_v48 = vsel %vm1273_vm4, %v1292_v24, %v1293_v25  ;;  %v3732_v17 = vld [vmem:[%s4510_s5 + $0x210] sm:$0xff]  }
  0x5c   : > { %3261 = vmatpush3.bf16.msra.mxu1 %v3702_v36  ;;  %3371 = vmatmul.mubr.bf16.vlgmr.msra.gmra.mrb[0].mxu0 %v4229_v46  ;;  %v674_v33 = vor.u32 %v672_v18, %v671_v26  ;;  %v4284_v36 = vsel %vm3965_vm3, %v671_v26, 0 }
  0x5d   : > { %3262 = vmatprep.subr.bf16.mxu1 %v3704_v12  ;;  %3387 = vmatpush3.bf16.msra.mxu0 %v4158_v4  ;;  %v3708_v4 = vld [vmem:[%s4510_s5 + $0xa0] sm:$0xff]   ;;  %v2307_v39 = vrot.slane %v4284_v36, 1 }
  0x5e   : > { %3374 = vmatprep.mubr.bf16.mxu0 %v4237_v53  ;;  %3388 = vmatprep.subr.bf16.mxu0 %v3699_v49  ;;  %v4297_v40 = vsel %vm3965_vm3, 0, %v674_v33 }
  0x5f   : > { %3247 = vmatmul.mubr.bf16.gmra.mrb[4].mxu1 %v4031_v58  ;;  %v2306_v43 = vrot.slane %v4297_v40, 1 }
  0x60   : > { %3263 = vmatpush3.bf16.msra.mxu1 %v3704_v12  ;;  %3250 = vmatprep.mubr.bf16.mxu1 %v4077_v52  ;;  %v4303_v12 = vsel %vm1273_vm4, %v1295_v31, %v1296_v32 }
  0x61   : > { %3264 = vmatprep.subr.bf16.mxu1 %v3706_v55  ;;  %3389 = vmatpush3.bf16.msra.mxu0 %v3699_v49  ;;  %v4312_v44 = vsel %vm1273_vm4, %v2306_v43, %v2307_v39  ;;  %v3716_v49 = vld [vmem:[%s4510_s5 + $0xc0] sm:$0xff]  }
  0x62   : > { %3390 = vmatprep.subr.bf16.mxu0 %v3701_v62 }
  0x64   : > { %3265 = vmatpush3.bf16.msra.mxu1 %v3706_v55  ;;  %3375 = vmatmul.mubr.bf16.gmra.mrb[4].mxu0 %v4260_v9  ;;  %v4325_v55 = vsel %vm1273_vm4, %v1804_v45, %v1805_v47 }
  0x65   : > { %3266 = vmatprep.subr.bf16.mxu1 %v3708_v4  ;;  %3391 = vmatpush3.bf16.msra.mxu0 %v3701_v62  ;;  %v3717_v62 = vld [vmem:[%s4510_s5 + $0x1d0] sm:$0xff]  }
  0x66   : > { %3378 = vmatprep.mubr.bf16.mxu0 %v4266_v13  ;;  %3392 = vmatprep.subr.bf16.mxu0 %v3703_v59 }
  0x67   : > { %3251 = vmatmul.mubr.bf16.gmra.mrb[8].mxu1 %v4098_v19 }
  0x68   : > { %3267 = vmatpush3.bf16.msra.mxu1 %v3708_v4  ;;  %3254 = vmatprep.mubr.bf16.mxu1 %v4119_v34  ;;  %v3725_v4 = vld [vmem:[%s4510_s5 + $0x1f0] sm:$0xff]  }
  0x69   : > { %3268 = vmatprep.subr.bf16.mxu1 %v3710_v22  ;;  %3393 = vmatpush3.bf16.msra.mxu0 %v3703_v59  ;;  %v3729_v59 = vld [vmem:[%s4510_s5 + $0x200] sm:$0xff]  }
  0x6a   : > { %3394 = vmatprep.subr.bf16.mxu0 %v3705_v29 }
  0x6c   : > { %3269 = vmatpush3.bf16.msra.mxu1 %v3710_v22  ;;  %3379 = vmatmul.mubr.bf16.gmra.mrb[8].mxu0 %v4293_v48 }
  0x6d   : > { %3270 = vmatprep.subr.bf16.mxu1 %v3712_v28  ;;  %3395 = vmatpush3.bf16.msra.mxu0 %v3705_v29 }
  0x6e   : > { %3382 = vmatprep.mubr.bf16.mxu0 %v4303_v12  ;;  %3396 = vmatprep.subr.bf16.mxu0 %v3707_v42 }
  0x6f   : > { %3255 = vmatmul.mubr.bf16.gmra.mrb[12].mxu1 %v4144_v60 }
  0x70   : > { %3271 = vmatpush3.bf16.msra.mxu1 %v3712_v28  ;;  %3274 = vmatprep.mubr.bf16.mxu1 %v1276_v51 }
  0x71   : > { %3272 = vmatprep.subr.bf16.mxu1 %v3714_v63  ;;  %3397 = vmatpush3.bf16.msra.mxu0 %v3707_v42 }
  0x72   : > { %3398 = vmatprep.subr.bf16.mxu0 %v3709_v8 }
  0x74   : > { %3273 = vmatpush3.bf16.msra.mxu1 %v3714_v63  ;;  %3383 = vmatmul.mubr.bf16.gmra.mrb[12].mxu0 %v4325_v55 }
  0x75   : > { %3290 = vmatprep.subr.bf16.mxu1 %v3716_v49  ;;  %3399 = vmatpush3.bf16.msra.mxu0 %v3709_v8 }
  0x76   : > { %3402 = vmatprep.mubr.bf16.mxu0 %v3995_v23  ;;  %3400 = vmatprep.subr.bf16.mxu0 %v3711_v16 }
  0x77   : > { %3275 = vmatmul.mubr.bf16.vlgmr.msra.gmra.mrb[0].mxu1 %v4204_v35  ;;  %v3722_v35 = vld [vmem:[%s4510_s5 + $0xd8] sm:$0xff]  }
  0x78   : > { %3291 = vmatpush3.bf16.msra.mxu1 %v3716_v49  ;;  %3278 = vmatprep.mubr.bf16.mxu1 %v4229_v46 }
  0x79   : > { %3292 = vmatprep.subr.bf16.mxu1 %v3718_v56  ;;  %3401 = vmatpush3.bf16.msra.mxu0 %v3711_v16 }
  0x7a   : > { %3418 = vmatprep.subr.bf16.mxu0 %v3713_v57 }
  0x7c   : > { %3293 = vmatpush3.bf16.msra.mxu1 %v3718_v56  ;;  %3403 = vmatmul.mubr.bf16.vlgmr.msra.gmra.mrb[0].mxu0 %v4031_v58 }
  0x7d   : > { %3294 = vmatprep.subr.bf16.mxu1 %v3720_v11  ;;  %3419 = vmatpush3.bf16.msra.mxu0 %v3713_v57 }
  0x7e   : > { %3406 = vmatprep.mubr.bf16.mxu0 %v4077_v52  ;;  %3420 = vmatprep.subr.bf16.mxu0 %v3715_v61 }
  0x7f   : > { %3279 = vmatmul.mubr.bf16.gmra.mrb[4].mxu1 %v4237_v53 }
  0x80   : > { %3295 = vmatpush3.bf16.msra.mxu1 %v3720_v11  ;;  %3282 = vmatprep.mubr.bf16.mxu1 %v4260_v9 }
  0x81   : > { %3296 = vmatprep.subr.bf16.mxu1 %v3722_v35  ;;  %3421 = vmatpush3.bf16.msra.mxu0 %v3715_v61 }
  0x82   : > { %3422 = vmatprep.subr.bf16.mxu0 %v3717_v62 }
  0x84   : > { %3297 = vmatpush3.bf16.msra.mxu1 %v3722_v35  ;;  %3407 = vmatmul.mubr.bf16.gmra.mrb[4].mxu0 %v4098_v19 }
  0x85   : > { %3298 = vmatprep.subr.bf16.mxu1 %v3724_v0  ;;  %3423 = vmatpush3.bf16.msra.mxu0 %v3717_v62 }
  0x86   : > { %3410 = vmatprep.mubr.bf16.mxu0 %v4119_v34  ;;  %3424 = vmatprep.subr.bf16.mxu0 %v3719_v2 }
  0x87   : > { %3283 = vmatmul.mubr.bf16.gmra.mrb[8].mxu1 %v4266_v13 }
  0x88   : > { %3299 = vmatpush3.bf16.msra.mxu1 %v3724_v0  ;;  %3286 = vmatprep.mubr.bf16.mxu1 %v4293_v48 }
  0x89   : > { %3300 = vmatprep.subr.bf16.mxu1 %v3726_v3  ;;  %3425 = vmatpush3.bf16.msra.mxu0 %v3719_v2 }
  0x8a   : > { %3426 = vmatprep.subr.bf16.mxu0 %v3721_v15 }
  0x8c   : > { %3301 = vmatpush3.bf16.msra.mxu1 %v3726_v3  ;;  %3411 = vmatmul.mubr.bf16.gmra.mrb[8].mxu0 %v4144_v60 }
  0x8d   : > { %3302 = vmatprep.subr.bf16.mxu1 %v3728_v6  ;;  %3427 = vmatpush3.bf16.msra.mxu0 %v3721_v15 }
  0x8e   : > { %3414 = vmatprep.mubr.bf16.mxu0 %v4182_v21  ;;  %3428 = vmatprep.subr.bf16.mxu0 %v3723_v41 }
  0x8f   : > { %3287 = vmatmul.mubr.bf16.gmra.mrb[12].mxu1 %v4303_v12 }
  0x90   : > { %3303 = vmatpush3.bf16.msra.mxu1 %v3728_v6  ;;  %3306 = vmatprep.mubr.bf16.mxu1 %v3985_v14  ;;  %v3731_v14 = vld [vmem:[%s4510_s5 + $0x208] sm:$0xff]  }
  0x91   : > { %3304 = vmatprep.subr.bf16.mxu1 %v3730_v7  ;;  %3429 = vmatpush3.bf16.msra.mxu0 %v3723_v41 }
  0x92   : > { %3430 = vmatprep.subr.bf16.mxu0 %v3725_v4 }
  0x94   : > { %3305 = vmatpush3.bf16.msra.mxu1 %v3730_v7  ;;  %3415 = vmatmul.mubr.bf16.gmra.mrb[12].mxu0 %v4297_v40 }
  0x95   : > { %3482 = vmatprep.subr.bf16.mxu1 %v3729_v59  ;;  %3431 = vmatpush3.bf16.msra.mxu0 %v3725_v4 }
  0x96   : > { %3434 = vmatprep.mubr.bf16.mxu0 %v4018_v50  ;;  %3432 = vmatprep.subr.bf16.mxu0 %v3727_v10  ;;  %v3734_v50 = vld [vmem:[%s4510_s5 + $0x220] sm:$0xff]  }
  0x97   : > { %3307 = vmatmul.mubr.bf16.vlgmr.msra.gmra.mrb[0].mxu1 %v3995_v23  ;;  %v3733_v23 = vld [vmem:[%s4510_s5 + $0x218] sm:$0xff]  }
  0x98   : > { %3490 = vmatpush3.bf16.msra.mxu1 %v3729_v59  ;;  %3310 = vmatprep.mubr.bf16.mxu1 %v4031_v58  ;;  %v2133_v58 = vshll.u32 %v4297_v40, 16 }
  0x99   : > { %3483 = vmatprep.subr.bf16.mxu1 %v3731_v14  ;;  %3433 = vmatpush3.bf16.msra.mxu0 %v3727_v10 }
  0x9a   : > { %3450 = vmatprep.subr.bf16.mxu0 %v3729_v59 }
  0x9c   : > { %3491 = vmatpush3.bf16.msra.mxu1 %v3731_v14  ;;  %3435 = vmatmul.mubr.bf16.vlgmr.msra.gmra.mrb[0].mxu0 %v4052_v30  ;;  %v3735_v30 = vld [vmem:[%s4510_s5 + $0x228] sm:$0xff]  }
  0x9d   : > { %3484 = vmatprep.subr.bf16.mxu1 %v3732_v17  ;;  %3451 = vmatpush3.bf16.msra.mxu0 %v3729_v59 }
  0x9e   : > { %3438 = vmatprep.mubr.bf16.mxu0 %v4107_v27  ;;  %3452 = vmatprep.subr.bf16.mxu0 %v3731_v14  ;;  %v2138_v27 = vshll.u32 %v4284_v36, 16 }
  0x9f   : > { %3311 = vmatmul.mubr.bf16.gmra.mrb[4].mxu1 %v4077_v52  ;;  %v2131_v52 = vshrl.u32 %v4297_v40, 16 }
  0xa0   : > { %3492 = vmatpush3.bf16.msra.mxu1 %v3732_v17  ;;  %3314 = vmatprep.mubr.bf16.mxu1 %v4098_v19  ;;  %v2135_v19 = vrot.slane %v2133_v58, 1 }
  0xa1   : > { %3485 = vmatprep.subr.bf16.mxu1 %v3733_v23  ;;  %3453 = vmatpush3.bf16.msra.mxu0 %v3731_v14 }
  0xa2   : > { %3454 = vmatprep.subr.bf16.mxu0 %v3732_v17 }
  0xa4   : > { %3493 = vmatpush3.bf16.msra.mxu1 %v3733_v23  ;;  %3439 = vmatmul.mubr.bf16.gmra.mrb[4].mxu0 %v4137_v54  ;;  %v3736_v54 = vld [vmem:[%s4510_s5 + $0x230] sm:$0xff]  }
  0xa5   : > { %3486 = vmatprep.subr.bf16.mxu1 %v3734_v50  ;;  %3455 = vmatpush3.bf16.msra.mxu0 %v3732_v17 }
  0xa6   : > { %3442 = vmatprep.mubr.bf16.mxu0 %v4150_v1  ;;  %3456 = vmatprep.subr.bf16.mxu0 %v3733_v23  ;;  %v3737_v1 = vld [vmem:[%s4510_s5 + $0x238] sm:$0xff]  }
  0xa7   : > { %3315 = vmatmul.mubr.bf16.gmra.mrb[8].mxu1 %v4119_v34  ;;  %v2136_v34 = vor.u32 %v2135_v19, %v2131_v52 }
  0xa8   : > { %3494 = vmatpush3.bf16.msra.mxu1 %v3734_v50  ;;  %3318 = vmatprep.mubr.bf16.mxu1 %v4144_v60  ;;  %v2140_v60 = vrot.slane %v2138_v27, 1 }
  0xa9   : > { %3487 = vmatprep.subr.bf16.mxu1 %v3735_v30  ;;  %3457 = vmatpush3.bf16.msra.mxu0 %v3733_v23 }
  0xaa   : > { %3458 = vmatprep.subr.bf16.mxu0 %v3734_v50 }
  0xac   : > { %3495 = vmatpush3.bf16.msra.mxu1 %v3735_v30  ;;  %3443 = vmatmul.mubr.bf16.gmra.mrb[8].mxu0 %v4178_v20  ;;  %v2141_v20 = vsel %vm862_vm2, %v2136_v34, %v2140_v60 }
  0xad   : > { %3488 = vmatprep.subr.bf16.mxu1 %v3736_v54  ;;  %3459 = vmatpush3.bf16.msra.mxu0 %v3734_v50 }
  0xae   : > { %3446 = vmatprep.mubr.bf16.mxu0 %v4210_v5  ;;  %3460 = vmatprep.subr.bf16.mxu0 %v3735_v30 }
  0xaf   : > { %3319 = vmatmul.mubr.bf16.gmra.mrb[12].mxu1 %v4182_v21 }
  0xb0   : > { %3496 = vmatpush3.bf16.msra.mxu1 %v3736_v54  ;;  %3474 = vmatprep.mubr.bf16.mxu1 %v4293_v48 }
  0xb1   : > { %3489 = vmatprep.subr.bf16.mxu1 %v3737_v1  ;;  %3461 = vmatpush3.bf16.msra.mxu0 %v3735_v30 }
  0xb2   : > { %3462 = vmatprep.subr.bf16.mxu0 %v3736_v54 }
  0xb4   : > { %3497 = vmatpush3.bf16.msra.mxu1 %v3737_v1  ;;  %3447 = vmatmul.mubr.bf16.gmra.mrb[12].mxu0 %v2141_v20 }
  0xb5   : > { %3463 = vmatpush3.bf16.msra.mxu0 %v3736_v54  ;;  %3466 = vmatprep.mubr.bf16.mxu0 %v4229_v46 }
  0xb6   : > { %3464 = vmatprep.subr.bf16.mxu0 %v3737_v1 }
  0xb7   : > { %3475 = vmatmul.mubr.bf16.vlgmr.msra.gmra.mrb[16].mxu1 %v4303_v12 }
  0xb8   : > { %3478 = vmatprep.mubr.bf16.mxu1 %v4325_v55 }
  0xb9   : > { %3465 = vmatpush3.bf16.msra.mxu0 %v3737_v1 }
  0xbc   : > { %3467 = vmatmul.mubr.bf16.vlgmr.msra.gmra.mrb[0].mxu0 %v4237_v53 }
  0xbd   : > { %3470 = vmatprep.mubr.bf16.mxu0 %v4260_v9 }
  0xbf   : > { %3479 = vmatmul.mubr.bf16.gmra.mrb[20].mxu1 %v4312_v44 }
  0xc4   : > { %3471 = vmatmul.mubr.bf16.gmra.mrb[4].mxu0 %v4266_v13 }
 0x16a   : > { %v3308_v21 = vpop.f32.mrb[0].mxu1 }
 0x16b   : > { %v1549_v5 = vpop.f32.mrb[1].mxu1 }
 0x16c   : > { %v3309_v18 = vpop.f32.mrb[2].mxu1 }
 0x16d   : > { %v1552_v22 = vpop.f32.mrb[3].mxu1 }
 0x172   : > { %v4442_v24 = vpop.f32.mrb[4].mxu1 }
 0x173   : > { %v4444_v46 = vpop.f32.mrb[5].mxu1 }
 0x174   : > { %v4446_v25 = vpop.f32.mrb[6].mxu1 }
 0x175   : > { %v4448_v26 = vpop.f32.mrb[7].mxu1 }
 0x17a   : > { %v3316_v29 = vpop.f32.mrb[8].mxu1 }
 0x17b   : > { %v1581_v53 = vpop.f32.mrb[9].mxu1 }
 0x17c   : > { %v3317_v31 = vpop.f32.mrb[10].mxu1 }
 0x17d   : > { %v1584_v9 = vpop.f32.mrb[11].mxu1 }
 0x17f   : > { %v3444_v32 = vpop.f32.mrb[8].mxu0 }
 0x180   : > { %v2257_v33 = vpop.f32.mrb[9].mxu0  ;;  %v3506_v36 = vadd.f32 %v3444_v32, %v3316_v29 }
 0x181   : > { %v3445_v13 = vpop.f32.mrb[10].mxu0  ;;  %v3508_v28 = vadd.f32 %v2257_v33, %v1581_v53 }
 0x182   : > { %v3320_v37 = vpop.f32.mrb[12].mxu1  ;;  %v2260_v38 = vpop.f32.mrb[11].mxu0  ;;  %v3510_v39 = vadd.f32 %v3445_v13, %v3317_v31 }
 0x183   : > { %v1597_v48 = vpop.f32.mrb[13].mxu1  ;;  %v3512_v40 = vadd.f32 %v2260_v38, %v1584_v9 }
 0x184   : > { %v3321_v42 = vpop.f32.mrb[14].mxu1 }
 0x185   : > { %v1600_v12 = vpop.f32.mrb[15].mxu1 }
 0x187   : > { %v3448_v43 = vpop.f32.mrb[12].mxu0 }
 0x188   : > { %v2273_v63 = vpop.f32.mrb[13].mxu0  ;;  %v3514_v51 = vadd.f32 %v3448_v43, %v3320_v37 }
 0x189   : > { %v3449_v44 = vpop.f32.mrb[14].mxu0  ;;  %v3516_v45 = vadd.f32 %v2273_v63, %v1597_v48 }
 0x18a   : > { %v3476_v47 = vpop.f32.mrb[16].mxu1  ;;  %v2276_v8 = vpop.f32.mrb[15].mxu0  ;;  %v3518_v49 = vadd.f32 %v3449_v44, %v3321_v42 }
 0x18b   : > { %v3507_v55 = vadd.f32 %v3506_v36, %v3476_v47  ;;  %v2424_v16 = vpop.f32.mrb[17].mxu1  ;;  %v3520_v56 = vadd.f32 %v2276_v8, %v1600_v12 }
 0x18c   : > { %v3509_v57 = vadd.f32 %v3508_v28, %v2424_v16  ;;  %v3477_v11 = vpop.f32.mrb[18].mxu1 }
 0x18d   : > { %v3511_v61 = vadd.f32 %v3510_v39, %v3477_v11  ;;  %v2427_v35 = vpop.f32.mrb[19].mxu1 }
 0x18e   : > { %v3513_v62 = vadd.f32 %v3512_v40, %v2427_v35 }
 0x18f   : > { %v4450_v0 = vpack.c.bf16 %v3511_v61, %v3507_v55  ;;  %v3468_v2 = vpop.f32.mrb[0].mxu0 }
 0x190   : > { %v4459_v3 = vpack.c.bf16 %v3513_v62, %v3509_v57  ;;  %v3498_v15 = vadd.f32 %v3468_v2, %v3308_v21  ;;  %v2392_v6 = vpop.f32.mrb[1].mxu0 }
 0x191   : > { %3047 = vst [vmem:[%s4457_s10 + $0x28] sm:$0xff] %v4450_v0   ;;  %v3499_v41 = vadd.f32 %v2392_v6, %v1549_v5  ;;  %v3469_v7 = vpop.f32.mrb[2].mxu0  ;;  %v2561_v62 = vunpack.c.l.bf16 %v4450_v0 }
 0x192   : > { %3046 = vst [vmem:[%s4457_s10 + $0x20] sm:$0xff] %v4459_v3   ;;  %v3480_v4 = vpop.f32.mrb[20].mxu1  ;;  %v3500_v10 = vadd.f32 %v3469_v7, %v3309_v18  ;;  %v2395_v59 = vpop.f32.mrb[3].mxu0  ;;  %v2559_v55 = vunpack.c.l.bf16 %v4459_v3  ;;  %v2560_v57 = vunpack.c.h.bf16 %v4459_v3 }
 0x193   : > { %v3515_v14 = vadd.f32 %v3514_v51, %v3480_v4  ;;  %v2440_v17 = vpop.f32.mrb[21].mxu1  ;;  %v3501_v23 = vadd.f32 %v2395_v59, %v1552_v22  ;;  %v2598_v59 = vmul.f32 %v2561_v62, %v2561_v62 }
 0x194   : > { %v3517_v50 = vadd.f32 %v3516_v45, %v2440_v17  ;;  %v3481_v58 = vpop.f32.mrb[22].mxu1  ;;  %v2472_v30 = vpack.c.bf16 %v3500_v10, %v3498_v15  ;;  %v2596_v2 = vmul.f32 %v2559_v55, %v2559_v55  ;;  %v2597_v7 = vmul.f32 %v2560_v57, %v2560_v57 }
 0x195   : > { %v3519_v52 = vadd.f32 %v3518_v49, %v3481_v58  ;;  %v2443_v19 = vpop.f32.mrb[23].mxu1  ;;  %v2471_v27 = vpack.c.bf16 %v3501_v23, %v3499_v41  ;;  %v2562_v41 = vunpack.c.h.bf16 %v4450_v0 }
 0x196   : > { %v3521_v54 = vadd.f32 %v3520_v56, %v2443_v19  ;;  %3043 = vst [vmem:[%s4457_s10 + $0x8] sm:$0xff] %v2472_v30   ;;  %v2553_v60 = vunpack.c.l.bf16 %v2472_v30  ;;  %v2554_v18 = vunpack.c.h.bf16 %v2472_v30 }
 0x197   : > { %v4466_v34 = vpack.c.bf16 %v3519_v52, %v3515_v14  ;;  %3000 = vst [vmem:[%s4457_s10] sm:$0xff] %v2471_v27   ;;  %v2551_v1 = vunpack.c.l.bf16 %v2471_v27  ;;  %v2552_v20 = vunpack.c.h.bf16 %v2471_v27  ;;  %v3472_v21 = vpop.f32.mrb[4].mxu0 }
 0x198   : > { %v2477_v5 = vpack.c.bf16 %v3521_v54, %v3517_v50  ;;  %v3502_v22 = vadd.f32 %v3472_v21, %v4442_v24  ;;  %v2408_v29 = vpop.f32.mrb[5].mxu0  ;;  %v2590_v28 = vmul.f32 %v2553_v60, %v2553_v60  ;;  %v2591_v48 = vmul.f32 %v2554_v18, %v2554_v18 }
 0x199   : > { %3049 = vst [vmem:[%s4457_s10 + $0x38] sm:$0xff] %v4466_v34   ;;  %v2567_v53 = vadd.f32 %v2552_v20, %v2551_v1  ;;  %v2588_v31 = vmul.f32 %v2551_v1, %v2551_v1  ;;  %v2589_v9 = vmul.f32 %v2552_v20, %v2552_v20  ;;  %v3503_v32 = vadd.f32 %v2408_v29, %v4444_v46  ;;  %v3473_v33 = vpop.f32.mrb[6].mxu0 }
 0x19a   : > { %3048 = vst [vmem:[%s4457_s10 + $0x30] sm:$0xff] %v2477_v5   ;;  %v3504_v36 = vadd.f32 %v3473_v33, %v4446_v25  ;;  %v2411_v13 = vpop.f32.mrb[7].mxu0  ;;  %v2563_v14 = vunpack.c.l.bf16 %v2477_v5  ;;  %v2599_v50 = vmul.f32 %v2562_v41, %v2562_v41  ;;  %v2564_v3 = vunpack.c.h.bf16 %v2477_v5 }
 0x19b   : > { %v2568_v37 = vadd.f32 %v2567_v53, %v2553_v60  ;;  %v2604_v38 = vadd.f32 %v2589_v9, %v2588_v31  ;;  %v3505_v24 = vadd.f32 %v2411_v13, %v4448_v26  ;;  %v2565_v52 = vunpack.c.l.bf16 %v4466_v34 }
 0x19c   : > { %v2474_v39 = vpack.c.bf16 %v3504_v36, %v3502_v22  ;;  %v2600_v27 = vmul.f32 %v2563_v14, %v2563_v14  ;;  %v2566_v0 = vunpack.c.h.bf16 %v4466_v34  ;;  %v2601_v1 = vmul.f32 %v2564_v3, %v2564_v3 }
 0x19d   : > { %v2605_v40 = vadd.f32 %v2604_v38, %v2590_v28  ;;  %v2473_v42 = vpack.c.bf16 %v3505_v24, %v3503_v32  ;;  %v2569_v12 = vadd.f32 %v2568_v37, %v2554_v18  ;;  %v2602_v21 = vmul.f32 %v2565_v52, %v2565_v52 }
 0x19e   : > { %3045 = vst [vmem:[%s4457_s10 + $0x18] sm:$0xff] %v2474_v39   ;;  %v2557_v51 = vunpack.c.l.bf16 %v2474_v39  ;;  %v2558_v25 = vunpack.c.h.bf16 %v2474_v39  ;;  %v2603_v29 = vmul.f32 %v2566_v0, %v2566_v0 }
 0x19f   : > { %3044 = vst [vmem:[%s4457_s10 + $0x10] sm:$0xff] %v2473_v42   ;;  %v2555_v43 = vunpack.c.l.bf16 %v2473_v42  ;;  %v2556_v63 = vunpack.c.h.bf16 %v2473_v42  ;;  %v2606_v46 = vadd.f32 %v2605_v40, %v2591_v48 }
 0x1a0   : > { %v2594_v26 = vmul.f32 %v2557_v51, %v2557_v51  ;;  %v2595_v11 = vmul.f32 %v2558_v25, %v2558_v25 }
 0x1a1   : > { %v2570_v44 = vadd.f32 %v2569_v12, %v2555_v43  ;;  %v2592_v45 = vmul.f32 %v2555_v43, %v2555_v43  ;;  %v2593_v8 = vmul.f32 %v2556_v63, %v2556_v63 }
 0x1a3   : > { %v2571_v47 = vadd.f32 %v2570_v44, %v2556_v63  ;;  %v2607_v49 = vadd.f32 %v2606_v46, %v2592_v45 }
 0x1a5   : > { %v2572_v16 = vadd.f32 %v2571_v47, %v2557_v51  ;;  %v2608_v56 = vadd.f32 %v2607_v49, %v2593_v8 }
 0x1a7   : > { %v2573_v61 = vadd.f32 %v2572_v16, %v2558_v25  ;;  %v2609_v35 = vadd.f32 %v2608_v56, %v2594_v26 }
 0x1a9   : > { %v2574_v15 = vadd.f32 %v2573_v61, %v2559_v55  ;;  %v2610_v6 = vadd.f32 %v2609_v35, %v2595_v11 }
 0x1ab   : > { %v2611_v4 = vadd.f32 %v2610_v6, %v2596_v2  ;;  %v2575_v10 = vadd.f32 %v2574_v15, %v2560_v57 }
 0x1ad   : > { %v2576_v17 = vadd.f32 %v2575_v10, %v2561_v62  ;;  %v2612_v23 = vadd.f32 %v2611_v4, %v2597_v7 }
 0x1af   : > { %v2577_v58 = vadd.f32 %v2576_v17, %v2562_v41  ;;  %v2613_v30 = vadd.f32 %v2612_v23, %v2598_v59 }
 0x1b1   : > { %v2578_v19 = vadd.f32 %v2577_v58, %v2563_v14  ;;  %v2614_v54 = vadd.f32 %v2613_v30, %v2599_v50 }
 0x1b3   : > { %v2579_v60 = vadd.f32 %v2578_v19, %v2564_v3  ;;  %v2615_v20 = vadd.f32 %v2614_v54, %v2600_v27 }
 0x1b5   : > { %v2580_v18 = vadd.f32 %v2579_v60, %v2565_v52  ;;  %v2616_v22 = vadd.f32 %v2615_v20, %v2601_v1 }
 0x1b7   : > { %v2581_v5 = vadd.f32 %v2580_v18, %v2566_v0  ;;  %v2617_v53 = vadd.f32 %v2616_v22, %v2602_v21 }
 0x1b9   : > { %v2582_v31 = vrot.slane %v2581_v5, 4  ;;  %v2618_v9 = vadd.f32 %v2617_v53, %v2603_v29 }
 0x1bb   : > { %v2583_v32 = vadd.f32 %v2582_v31, %v2581_v5  ;;  %v2619_v33 = vrot.slane %v2618_v9, 4 }
 0x1bd   : > { %v2584_v36 = vrot.slane %v2583_v32, 2  ;;  %v2620_v13 = vadd.f32 %v2619_v33, %v2618_v9 }
 0x1bf   : > { %v2585_v34 = vadd.f32 %v2584_v36, %v2583_v32  ;;  %v2621_v28 = vrot.slane %v2620_v13, 2 }
 0x1c1   : > { %v2586_v37 = vrot.slane %v2585_v34, 1  ;;  %v2622_v38 = vadd.f32 %v2621_v28, %v2620_v13 }
 0x1c3   : > { %v2623_v24 = vrot.slane %v2622_v38, 1  ;;  %v2587_v39 = vadd.f32 %v2586_v37, %v2585_v34 }
 0x1c5   : > { %v2624_v48 = vadd.f32 %v2623_v24, %v2622_v38 }
 0x1c7   : > { %v2626_v40 = vsel %vm695_vm0, %v2587_v39, %v2624_v48 }
 0x1c8   : > { %2627 = vst [vmem:[%s465_s24] sm:$0x3] %v2626_v40 }
 0x1c9 PF: > { %s18_s28 = sadd.s32 1, %s3776_s28   ;;  %s4516_s24 = smov %s3768_s26 }
 0x1ca   : > { %p15_p13 = scmp.ge.s32.totalorder %s18_s28, 6   ;;  %s4517_s25 = smov %s3772_s27 }
 0x1cb   : > { %s4518_s26 = smov %s4521_s29  ;;  %s4519_s27 = smov %s4525_s30 }
 0x1cc   :  { %17 = sbr.rel (!%p15_p13) target bundleno = 3 (0x3), region = 92 }

</bundles_post_ra>
